<compile_context>
chip_gen: v7x
topology: tpu7x:2x2x1
jax: 0.10.0
libtpu: 0.0.40
codegen_flags: <defaults>
</compile_context>

<pallas_src>
import functools

import jax
import jax.numpy as jnp
from jax.experimental import pallas as pl
from jax.experimental.pallas import tpu as pltpu

BLOCK_SIZE = 128   # torch `block_size` (max causal context length)
LN_EPS = 1e-5


def _layernorm(x, gamma, beta):
    mu = jnp.mean(x, axis=-1, keepdims=True)
    xc = x - mu
    var = jnp.mean(xc * xc, axis=-1, keepdims=True)
    inv = jax.lax.rsqrt(var + LN_EPS)
    return xc * inv * gamma + beta


def block_kernel(x_ref,
                 wqkv_ref, wp_ref, bp_ref,
                 w1_ref, b1_ref, w2_ref, b2_ref,
                 g1_ref, be1_ref, g2_ref, be2_ref,
                 o_ref, *, n_heads):
    Bb, T, C = x_ref.shape
    D = C // n_heads
    scale = D ** -0.5

    # Flatten the batch group so every linear layer sees M = Bb*T rows.
    x = x_ref[...].astype(jnp.float32).reshape(Bb * T, C)       # (M, C) f32
    xb = x.astype(jnp.bfloat16)

    # ---- fused QKV projection: one bf16 MXU pass, N = 3C ----
    qkv = jnp.dot(xb, wqkv_ref[...], preferred_element_type=jnp.float32)
    q = qkv[:, 0 * C:1 * C] * scale      # fold 1/sqrt(D) into q
    k = qkv[:, 1 * C:2 * C]
    v = qkv[:, 2 * C:3 * C]              # slices are 128-lane aligned (C % 128 == 0)

    # ---- head-batched causal self-attention ----
    # Build (H*Bb, T, D) stacks once; all score/softmax/PV work below is
    # batched over every head and batch element in the group.
    def split_heads(z):
        z3 = z.reshape(Bb, T, C)
        return jnp.concatenate(
            [z3[:, :, h * D:(h + 1) * D] for h in range(n_heads)], axis=0)

    qh = split_heads(q).astype(jnp.bfloat16)     # (H*Bb, T, D)
    kh = split_heads(k).astype(jnp.bfloat16)
    vh = split_heads(v).astype(jnp.bfloat16)

    row = jax.lax.broadcasted_iota(jnp.int32, (T, T), 0)
    col = jax.lax.broadcasted_iota(jnp.int32, (T, T), 1)
    causal = row >= col                          # tril mask

    s = jnp.einsum("btd,bsd->bts", qh, kh,
                   preferred_element_type=jnp.float32)          # (H*Bb, T, T) f32
    s = jnp.where(causal, s, -1e30)              # large finite negative
    m = jnp.max(s, axis=-1, keepdims=True)
    p = jnp.exp(s - m)                           # f32 softmax
    p = p * pl.reciprocal(jnp.sum(p, axis=-1, keepdims=True), approx=True)
    oh = jnp.einsum("bts,bsd->btd", p.astype(jnp.bfloat16), vh,
                    preferred_element_type=jnp.float32)          # (H*Bb, T, D)

    # merge heads back to (M, C)
    sa = jnp.concatenate(
        [oh[h * Bb:(h + 1) * Bb] for h in range(n_heads)], axis=-1)  # (Bb, T, C)
    sa = sa.reshape(Bb * T, C)

    # attention output projection
    y = jnp.dot(sa.astype(jnp.bfloat16), wp_ref[...],
                preferred_element_type=jnp.float32) + bp_ref[...]

    # ---- residual + LayerNorm 1 (f32 elementwise) ----
    x1 = _layernorm(x + y, g1_ref[...], be1_ref[...])

    # ---- feed-forward: Linear(C,4C) -> ReLU -> Linear(4C,C) ----
    h1 = jnp.dot(x1.astype(jnp.bfloat16), w1_ref[...],
                 preferred_element_type=jnp.float32) + b1_ref[...]
    h1 = jnp.maximum(h1, 0.0)
    y2 = jnp.dot(h1.astype(jnp.bfloat16), w2_ref[...],
                 preferred_element_type=jnp.float32) + b2_ref[...]

    # ---- residual + LayerNorm 2 ----
    x2 = _layernorm(x1 + y2, g2_ref[...], be2_ref[...])

    o_ref[...] = x2.reshape(Bb, T, C).astype(o_ref.dtype)


def _choose_batch_group(B, T):
    # Group enough batch elements per grid step to push M = Bb*T toward 128
    # MXU rows.  Keep the (Bb,T,C)<->(Bb*T,C) reshape layout-clean.
    if T % 8 != 0:
        return 1
    need = -(-128 // T)              # ceil(128 / T)
    for d in range(1, B + 1):
        if B % d == 0 and d >= need:
            return d
    return B


def block_forward(x, params, *, n_heads):
    # Torch semantics: truncate sequence to block_size before attention.
    x = x[:, :BLOCK_SIZE, :]
    B, T, C = x.shape
    (wq, wk, wv, wp, bp, w1, b1, w2, b2, g1, be1, g2, be2) = params

    # Fuse QKV and ship matmul weights as bf16 (half the HBM->VMEM bytes).
    wqkv = jnp.concatenate([wq, wk, wv], axis=1).astype(jnp.bfloat16)
    wp_b = wp.astype(jnp.bfloat16)
    w1_b = w1.astype(jnp.bfloat16)
    w2_b = w2.astype(jnp.bfloat16)

    Bb = _choose_batch_group(B, T)
    grid = (B // Bb,)

    def const_spec(shape):
        return pl.BlockSpec(shape, lambda b, _s=len(shape): (0,) * _s)

    in_specs = [
        pl.BlockSpec((Bb, T, C), lambda b: (b, 0, 0)),   # x
        const_spec((C, 3 * C)),                          # wqkv (bf16)
        const_spec((C, C)), const_spec((1, C)),          # wp (bf16), bp
        const_spec((C, 4 * C)), const_spec((1, 4 * C)),  # w1 (bf16), b1
        const_spec((4 * C, C)), const_spec((1, C)),      # w2 (bf16), b2
        const_spec((1, C)), const_spec((1, C)),          # ln1 gamma/beta
        const_spec((1, C)), const_spec((1, C)),          # ln2 gamma/beta
    ]
    out_specs = pl.BlockSpec((Bb, T, C), lambda b: (b, 0, 0))

    return pl.pallas_call(
        functools.partial(block_kernel, n_heads=n_heads),
        out_shape=jax.ShapeDtypeStruct((B, T, C), x.dtype),
        grid_spec=pltpu.PrefetchScalarGridSpec(
            num_scalar_prefetch=0,
            grid=grid,
            in_specs=in_specs,
            out_specs=out_specs,
        ),
        compiler_params=pltpu.CompilerParams(
            dimension_semantics=("parallel",),
            vmem_limit_bytes=32 * 1024 * 1024,
        ),
    )(x, wqkv, wp_b, bp, w1_b, b1, w2_b, b2, g1, be1, g2, be2)


def init_params(key, embed_dim):
    C = embed_dim
    ks = jax.random.split(key, 8)
    s = 0.02
    wq = s * jax.random.normal(ks[0], (C, C), jnp.float32)
    wk = s * jax.random.normal(ks[1], (C, C), jnp.float32)
    wv = s * jax.random.normal(ks[2], (C, C), jnp.float32)
    wp = s * jax.random.normal(ks[3], (C, C), jnp.float32)
    bp = s * jax.random.normal(ks[4], (1, C), jnp.float32)
    w1 = s * jax.random.normal(ks[5], (C, 4 * C), jnp.float32)
    b1 = s * jax.random.normal(ks[6], (1, 4 * C), jnp.float32)
    w2 = s * jax.random.normal(ks[7], (4 * C, C), jnp.float32)
    b2 = jnp.zeros((1, C), jnp.float32)
    g1 = jnp.ones((1, C), jnp.float32)
    be1 = jnp.zeros((1, C), jnp.float32)
    g2 = jnp.ones((1, C), jnp.float32)
    be2 = jnp.zeros((1, C), jnp.float32)
    return (wq, wk, wv, wp, bp, w1, b1, w2, b2, g1, be1, g2, be2)


def reference_forward(x, params, *, n_heads):
    # Pure-JAX f32 reference for correctness checking.
    (wq, wk, wv, wp, bp, w1, b1, w2, b2, g1, be1, g2, be2) = params
    x = x[:, :BLOCK_SIZE, :]
    B, T, C = x.shape
    D = C // n_heads
    q = (x @ wq).reshape(B, T, n_heads, D)
    k = (x @ wk).reshape(B, T, n_heads, D)
    v = (x @ wv).reshape(B, T, n_heads, D)
    scores = jnp.einsum("bthd,bshd->bhts", q, k) * (D ** -0.5)
    mask = jnp.tril(jnp.ones((T, T), bool))
    scores = jnp.where(mask[None, None], scores, -jnp.inf)
    p = jax.nn.softmax(scores, axis=-1)
    sa = jnp.einsum("bhts,bshd->bthd", p, v).reshape(B, T, C) @ wp + bp
    x1 = _layernorm(x + sa, g1, be1)
    ff = jnp.maximum(x1 @ w1 + b1, 0.0) @ w2 + b2
    return _layernorm(x1 + ff, g2, be2)


if __name__ == "__main__":
    # Small, consistent shapes: B=2, T=16, embed_dim=128, n_heads=4.
    B, T, C, H = 2, 16, 128, 4
    key = jax.random.PRNGKey(0)
    kx, kp = jax.random.split(key)
    x = jax.random.normal(kx, (B, T, C), jnp.float32)
    params = init_params(kp, C)

    out = block_forward(x, params, n_heads=H)
    out = jax.block_until_ready(out)

    ref = reference_forward(x, params, n_heads=H)
    assert out.shape == (B, T, C)
    # Loose tolerance: kernel uses bf16 matmul operands (f32 accumulation) and
    # an approximate reciprocal in the softmax.
    assert jnp.allclose(out, ref, atol=5e-2, rtol=5e-2)
    print("KERNEL_OK")
</pallas_src>

<mosaic_0001>
module attributes {stable_mosaic.version = 11 : i64} {
  func.func @block_kernel(%arg0: i32, %arg1: memref<2x16x128xf32, #tpu.memory_space<vmem>>, %arg2: memref<128x384xbf16, #tpu.memory_space<vmem>>, %arg3: memref<128x128xbf16, #tpu.memory_space<vmem>>, %arg4: memref<1x128xf32, #tpu.memory_space<vmem>>, %arg5: memref<128x512xbf16, #tpu.memory_space<vmem>>, %arg6: memref<1x512xf32, #tpu.memory_space<vmem>>, %arg7: memref<512x128xbf16, #tpu.memory_space<vmem>>, %arg8: memref<1x128xf32, #tpu.memory_space<vmem>>, %arg9: memref<1x128xf32, #tpu.memory_space<vmem>>, %arg10: memref<1x128xf32, #tpu.memory_space<vmem>>, %arg11: memref<1x128xf32, #tpu.memory_space<vmem>>, %arg12: memref<1x128xf32, #tpu.memory_space<vmem>>, %arg13: memref<2x16x128xf32, #tpu.memory_space<vmem>>) attributes {dimension_semantics = [#tpu.dimension_semantics<parallel>], iteration_bounds = array<i64: 1>, scalar_prefetch = 0 : i64, scratch_operands = 0 : i64, tpu.core_type = #tpu.core_type<tc>, window_params = [{transform_indices = @transform_0, window_bounds = array<i64: 2, 16, 128>}, {pipeline_mode = #tpu.pipeline_mode<synchronous>, transform_indices = @transform_1, window_bounds = array<i64: 128, 384>}, {pipeline_mode = #tpu.pipeline_mode<synchronous>, transform_indices = @transform_2, window_bounds = array<i64: 128, 128>}, {pipeline_mode = #tpu.pipeline_mode<synchronous>, transform_indices = @transform_3, window_bounds = array<i64: 1, 128>}, {pipeline_mode = #tpu.pipeline_mode<synchronous>, transform_indices = @transform_4, window_bounds = array<i64: 128, 512>}, {pipeline_mode = #tpu.pipeline_mode<synchronous>, transform_indices = @transform_5, window_bounds = array<i64: 1, 512>}, {pipeline_mode = #tpu.pipeline_mode<synchronous>, transform_indices = @transform_6, window_bounds = array<i64: 512, 128>}, {pipeline_mode = #tpu.pipeline_mode<synchronous>, transform_indices = @transform_7, window_bounds = array<i64: 1, 128>}, {pipeline_mode = #tpu.pipeline_mode<synchronous>, transform_indices = @transform_8, window_bounds = array<i64: 1, 128>}, {pipeline_mode = #tpu.pipeline_mode<synchronous>, transform_indices = @transform_9, window_bounds = array<i64: 1, 128>}, {pipeline_mode = #tpu.pipeline_mode<synchronous>, transform_indices = @transform_10, window_bounds = array<i64: 1, 128>}, {pipeline_mode = #tpu.pipeline_mode<synchronous>, transform_indices = @transform_11, window_bounds = array<i64: 1, 128>}, {transform_indices = @transform_12, window_bounds = array<i64: 2, 16, 128>}]} {
    %c0 = arith.constant 0 : index
    %c0_0 = arith.constant 0 : index
    %c0_1 = arith.constant 0 : index
    %0 = vector.load %arg1[%c0, %c0_0, %c0_1] : memref<2x16x128xf32, #tpu.memory_space<vmem>>, vector<2x16x128xf32>
    %1 = vector.shape_cast %0 : vector<2x16x128xf32> to vector<32x128xf32>
    %2 = arith.truncf %1 : vector<32x128xf32> to vector<32x128xbf16>
    %c0_2 = arith.constant 0 : index
    %c0_3 = arith.constant 0 : index
    %3 = vector.load %arg2[%c0_2, %c0_3] : memref<128x384xbf16, #tpu.memory_space<vmem>>, vector<128x384xbf16>
    %cst = arith.constant dense<0.000000e+00> : vector<32x384xf32>
    %4 = tpu.matmul %2, %3, %cst {dimension_numbers = #tpu.dot_dimension_numbers<[1], [0], [0], [1], [0, 0, 1, 1], [], []>} : vector<32x128xbf16>, vector<128x384xbf16>, vector<32x384xf32> -> vector<32x384xf32>
    %5 = vector.extract_strided_slice %4 {offsets = [0, 0], sizes = [32, 128], strides = [1, 1]} : vector<32x384xf32> to vector<32x128xf32>
    %cst_4 = arith.constant 0.176776692 : f32
    %6 = vector.broadcast %cst_4 : f32 to vector<32x128xf32>
    %7 = arith.mulf %5, %6 : vector<32x128xf32>
    %8 = vector.extract_strided_slice %4 {offsets = [0, 128], sizes = [32, 128], strides = [1, 1]} : vector<32x384xf32> to vector<32x128xf32>
    %9 = vector.extract_strided_slice %4 {offsets = [0, 256], sizes = [32, 128], strides = [1, 1]} : vector<32x384xf32> to vector<32x128xf32>
    %10 = vector.shape_cast %7 : vector<32x128xf32> to vector<2x16x128xf32>
    %11 = vector.extract_strided_slice %10 {offsets = [0, 0, 0], sizes = [2, 16, 32], strides = [1, 1, 1]} : vector<2x16x128xf32> to vector<2x16x32xf32>
    %12 = vector.extract_strided_slice %10 {offsets = [0, 0, 32], sizes = [2, 16, 32], strides = [1, 1, 1]} : vector<2x16x128xf32> to vector<2x16x32xf32>
    %13 = vector.extract_strided_slice %10 {offsets = [0, 0, 64], sizes = [2, 16, 32], strides = [1, 1, 1]} : vector<2x16x128xf32> to vector<2x16x32xf32>
    %14 = vector.extract_strided_slice %10 {offsets = [0, 0, 96], sizes = [2, 16, 32], strides = [1, 1, 1]} : vector<2x16x128xf32> to vector<2x16x32xf32>
    %15 = tpu.concatenate %11, %12, %13, %14 in 0 : vector<2x16x32xf32>, vector<2x16x32xf32>, vector<2x16x32xf32>, vector<2x16x32xf32> -> vector<8x16x32xf32>
    %16 = arith.truncf %15 : vector<8x16x32xf32> to vector<8x16x32xbf16>
    %17 = vector.shape_cast %8 : vector<32x128xf32> to vector<2x16x128xf32>
    %18 = vector.extract_strided_slice %17 {offsets = [0, 0, 0], sizes = [2, 16, 32], strides = [1, 1, 1]} : vector<2x16x128xf32> to vector<2x16x32xf32>
    %19 = vector.extract_strided_slice %17 {offsets = [0, 0, 32], sizes = [2, 16, 32], strides = [1, 1, 1]} : vector<2x16x128xf32> to vector<2x16x32xf32>
    %20 = vector.extract_strided_slice %17 {offsets = [0, 0, 64], sizes = [2, 16, 32], strides = [1, 1, 1]} : vector<2x16x128xf32> to vector<2x16x32xf32>
    %21 = vector.extract_strided_slice %17 {offsets = [0, 0, 96], sizes = [2, 16, 32], strides = [1, 1, 1]} : vector<2x16x128xf32> to vector<2x16x32xf32>
    %22 = tpu.concatenate %18, %19, %20, %21 in 0 : vector<2x16x32xf32>, vector<2x16x32xf32>, vector<2x16x32xf32>, vector<2x16x32xf32> -> vector<8x16x32xf32>
    %23 = arith.truncf %22 : vector<8x16x32xf32> to vector<8x16x32xbf16>
    %24 = vector.shape_cast %9 : vector<32x128xf32> to vector<2x16x128xf32>
    %25 = vector.extract_strided_slice %24 {offsets = [0, 0, 0], sizes = [2, 16, 32], strides = [1, 1, 1]} : vector<2x16x128xf32> to vector<2x16x32xf32>
    %26 = vector.extract_strided_slice %24 {offsets = [0, 0, 32], sizes = [2, 16, 32], strides = [1, 1, 1]} : vector<2x16x128xf32> to vector<2x16x32xf32>
    %27 = vector.extract_strided_slice %24 {offsets = [0, 0, 64], sizes = [2, 16, 32], strides = [1, 1, 1]} : vector<2x16x128xf32> to vector<2x16x32xf32>
    %28 = vector.extract_strided_slice %24 {offsets = [0, 0, 96], sizes = [2, 16, 32], strides = [1, 1, 1]} : vector<2x16x128xf32> to vector<2x16x32xf32>
    %29 = tpu.concatenate %25, %26, %27, %28 in 0 : vector<2x16x32xf32>, vector<2x16x32xf32>, vector<2x16x32xf32>, vector<2x16x32xf32> -> vector<8x16x32xf32>
    %30 = arith.truncf %29 : vector<8x16x32xf32> to vector<8x16x32xbf16>
    %31 = tpu.iota {dimensions = array<i32: 0>} : vector<16x16xi32>
    %32 = tpu.iota {dimensions = array<i32: 1>} : vector<16x16xi32>
    %33 = arith.cmpi sge, %31, %32 : vector<16x16xi32>
    "tpu.trace_start"() <{level = 10 : i32, message = "btd,bsd->bts"}> : () -> ()
    %cst_5 = arith.constant dense<0.000000e+00> : vector<8x16x16xf32>
    %34 = tpu.matmul %16, %23, %cst_5 {dimension_numbers = #tpu.dot_dimension_numbers<[2], [2], [1], [1], [0, 0, 0, 1, 1, 1], [0], [0]>} : vector<8x16x32xbf16>, vector<8x16x32xbf16>, vector<8x16x16xf32> -> vector<8x16x16xf32>
    %cst_6 = arith.constant -1.000000e+30 : f32
    "tpu.trace_stop"() : () -> ()
    %35 = vector.shape_cast %33 : vector<16x16xi1> to vector<1x16x16xi1>
    %36 = vector.broadcast %35 : vector<1x16x16xi1> to vector<8x16x16xi1>
    %37 = vector.broadcast %cst_6 : f32 to vector<8x16x16xf32>
    %38 = arith.select %36, %34, %37 : vector<8x16x16xi1>, vector<8x16x16xf32>
    %cst_7 = arith.constant dense<0xFF800000> : vector<8x16xf32>
    %39 = vector.multi_reduction <maximumf>, %38, %cst_7 [2] : vector<8x16x16xf32> to vector<8x16xf32>
    %40 = vector.shape_cast %39 : vector<8x16xf32> to vector<8x16x1xf32>
    %41 = vector.broadcast %40 : vector<8x16x1xf32> to vector<8x16x16xf32>
    %42 = arith.subf %38, %41 : vector<8x16x16xf32>
    %43 = math.exp %42 : vector<8x16x16xf32>
    %cst_8 = arith.constant dense<0.000000e+00> : vector<8x16xf32>
    %44 = vector.multi_reduction <add>, %43, %cst_8 [2] : vector<8x16x16xf32> to vector<8x16xf32>
    %45 = vector.shape_cast %44 : vector<8x16xf32> to vector<8x16x1xf32>
    %46 = tpu.reciprocal %45 {approx = true} : vector<8x16x1xf32> -> vector<8x16x1xf32>
    %47 = vector.broadcast %46 : vector<8x16x1xf32> to vector<8x16x16xf32>
    %48 = arith.mulf %43, %47 : vector<8x16x16xf32>
    %49 = arith.truncf %48 : vector<8x16x16xf32> to vector<8x16x16xbf16>
    "tpu.trace_start"() <{level = 10 : i32, message = "bts,bsd->btd"}> : () -> ()
    %cst_9 = arith.constant dense<0.000000e+00> : vector<8x16x32xf32>
    %50 = tpu.matmul %49, %30, %cst_9 {dimension_numbers = #tpu.dot_dimension_numbers<[2], [1], [1], [2], [0, 0, 0, 1, 1, 2], [0], [0]>} : vector<8x16x16xbf16>, vector<8x16x32xbf16>, vector<8x16x32xf32> -> vector<8x16x32xf32>
    "tpu.trace_stop"() : () -> ()
    %51 = vector.extract_strided_slice %50 {offsets = [0, 0, 0], sizes = [2, 16, 32], strides = [1, 1, 1]} : vector<8x16x32xf32> to vector<2x16x32xf32>
    %52 = vector.extract_strided_slice %50 {offsets = [2, 0, 0], sizes = [2, 16, 32], strides = [1, 1, 1]} : vector<8x16x32xf32> to vector<2x16x32xf32>
    %53 = vector.extract_strided_slice %50 {offsets = [4, 0, 0], sizes = [2, 16, 32], strides = [1, 1, 1]} : vector<8x16x32xf32> to vector<2x16x32xf32>
    %54 = vector.extract_strided_slice %50 {offsets = [6, 0, 0], sizes = [2, 16, 32], strides = [1, 1, 1]} : vector<8x16x32xf32> to vector<2x16x32xf32>
    %55 = tpu.concatenate %51, %52, %53, %54 in 2 : vector<2x16x32xf32>, vector<2x16x32xf32>, vector<2x16x32xf32>, vector<2x16x32xf32> -> vector<2x16x128xf32>
    %56 = vector.shape_cast %55 : vector<2x16x128xf32> to vector<32x128xf32>
    %57 = arith.truncf %56 : vector<32x128xf32> to vector<32x128xbf16>
    %c0_10 = arith.constant 0 : index
    %c0_11 = arith.constant 0 : index
    %58 = vector.load %arg3[%c0_10, %c0_11] : memref<128x128xbf16, #tpu.memory_space<vmem>>, vector<128x128xbf16>
    %cst_12 = arith.constant dense<0.000000e+00> : vector<32x128xf32>
    %59 = tpu.matmul %57, %58, %cst_12 {dimension_numbers = #tpu.dot_dimension_numbers<[1], [0], [0], [1], [0, 0, 1, 1], [], []>} : vector<32x128xbf16>, vector<128x128xbf16>, vector<32x128xf32> -> vector<32x128xf32>
    %c0_13 = arith.constant 0 : index
    %c0_14 = arith.constant 0 : index
    %60 = vector.load %arg4[%c0_13, %c0_14] : memref<1x128xf32, #tpu.memory_space<vmem>>, vector<1x128xf32>
    %61 = vector.broadcast %60 : vector<1x128xf32> to vector<32x128xf32>
    %62 = arith.addf %59, %61 : vector<32x128xf32>
    %63 = arith.addf %1, %62 : vector<32x128xf32>
    %c0_15 = arith.constant 0 : index
    %c0_16 = arith.constant 0 : index
    %64 = vector.load %arg9[%c0_15, %c0_16] : memref<1x128xf32, #tpu.memory_space<vmem>>, vector<1x128xf32>
    %c0_17 = arith.constant 0 : index
    %c0_18 = arith.constant 0 : index
    %65 = vector.load %arg10[%c0_17, %c0_18] : memref<1x128xf32, #tpu.memory_space<vmem>>, vector<1x128xf32>
    %cst_19 = arith.constant dense<0.000000e+00> : vector<32xf32>
    %66 = vector.multi_reduction <add>, %63, %cst_19 [1] : vector<32x128xf32> to vector<32xf32>
    %67 = vector.shape_cast %66 : vector<32xf32> to vector<32x1xf32>
    %cst_20 = arith.constant 1.280000e+02 : f32
    %68 = vector.broadcast %cst_20 : f32 to vector<32x1xf32>
    %69 = arith.divf %67, %68 : vector<32x1xf32>
    %70 = vector.broadcast %69 : vector<32x1xf32> to vector<32x128xf32>
    %71 = arith.subf %63, %70 : vector<32x128xf32>
    %72 = arith.mulf %71, %71 : vector<32x128xf32>
    %cst_21 = arith.constant dense<0.000000e+00> : vector<32xf32>
    %73 = vector.multi_reduction <add>, %72, %cst_21 [1] : vector<32x128xf32> to vector<32xf32>
    %74 = vector.shape_cast %73 : vector<32xf32> to vector<32x1xf32>
    %cst_22 = arith.constant 1.280000e+02 : f32
    %75 = vector.broadcast %cst_22 : f32 to vector<32x1xf32>
    %76 = arith.divf %74, %75 : vector<32x1xf32>
    %cst_23 = arith.constant 9.99999974E-6 : f32
    %77 = vector.broadcast %cst_23 : f32 to vector<32x1xf32>
    %78 = arith.addf %76, %77 : vector<32x1xf32>
    %79 = math.rsqrt %78 : vector<32x1xf32>
    %80 = vector.broadcast %79 : vector<32x1xf32> to vector<32x128xf32>
    %81 = arith.mulf %71, %80 : vector<32x128xf32>
    %82 = vector.broadcast %64 : vector<1x128xf32> to vector<32x128xf32>
    %83 = arith.mulf %81, %82 : vector<32x128xf32>
    %84 = vector.broadcast %65 : vector<1x128xf32> to vector<32x128xf32>
    %85 = arith.addf %83, %84 : vector<32x128xf32>
    %86 = arith.truncf %85 : vector<32x128xf32> to vector<32x128xbf16>
    %c0_24 = arith.constant 0 : index
    %c0_25 = arith.constant 0 : index
    %87 = vector.load %arg5[%c0_24, %c0_25] : memref<128x512xbf16, #tpu.memory_space<vmem>>, vector<128x512xbf16>
    %cst_26 = arith.constant dense<0.000000e+00> : vector<32x512xf32>
    %88 = tpu.matmul %86, %87, %cst_26 {dimension_numbers = #tpu.dot_dimension_numbers<[1], [0], [0], [1], [0, 0, 1, 1], [], []>} : vector<32x128xbf16>, vector<128x512xbf16>, vector<32x512xf32> -> vector<32x512xf32>
    %c0_27 = arith.constant 0 : index
    %c0_28 = arith.constant 0 : index
    %89 = vector.load %arg6[%c0_27, %c0_28] : memref<1x512xf32, #tpu.memory_space<vmem>>, vector<1x512xf32>
    %90 = vector.broadcast %89 : vector<1x512xf32> to vector<32x512xf32>
    %91 = arith.addf %88, %90 : vector<32x512xf32>
    %cst_29 = arith.constant 0.000000e+00 : f32
    %92 = vector.broadcast %cst_29 : f32 to vector<32x512xf32>
    %93 = arith.maximumf %91, %92 : vector<32x512xf32>
    %94 = arith.truncf %93 : vector<32x512xf32> to vector<32x512xbf16>
    %c0_30 = arith.constant 0 : index
    %c0_31 = arith.constant 0 : index
    %95 = vector.load %arg7[%c0_30, %c0_31] : memref<512x128xbf16, #tpu.memory_space<vmem>>, vector<512x128xbf16>
    %cst_32 = arith.constant dense<0.000000e+00> : vector<32x128xf32>
    %96 = tpu.matmul %94, %95, %cst_32 {dimension_numbers = #tpu.dot_dimension_numbers<[1], [0], [0], [1], [0, 0, 1, 1], [], []>} : vector<32x512xbf16>, vector<512x128xbf16>, vector<32x128xf32> -> vector<32x128xf32>
    %c0_33 = arith.constant 0 : index
    %c0_34 = arith.constant 0 : index
    %97 = vector.load %arg8[%c0_33, %c0_34] : memref<1x128xf32, #tpu.memory_space<vmem>>, vector<1x128xf32>
    %98 = vector.broadcast %97 : vector<1x128xf32> to vector<32x128xf32>
    %99 = arith.addf %96, %98 : vector<32x128xf32>
    %100 = arith.addf %85, %99 : vector<32x128xf32>
    %c0_35 = arith.constant 0 : index
    %c0_36 = arith.constant 0 : index
    %101 = vector.load %arg11[%c0_35, %c0_36] : memref<1x128xf32, #tpu.memory_space<vmem>>, vector<1x128xf32>
    %c0_37 = arith.constant 0 : index
    %c0_38 = arith.constant 0 : index
    %102 = vector.load %arg12[%c0_37, %c0_38] : memref<1x128xf32, #tpu.memory_space<vmem>>, vector<1x128xf32>
    %cst_39 = arith.constant dense<0.000000e+00> : vector<32xf32>
    %103 = vector.multi_reduction <add>, %100, %cst_39 [1] : vector<32x128xf32> to vector<32xf32>
    %104 = vector.shape_cast %103 : vector<32xf32> to vector<32x1xf32>
    %cst_40 = arith.constant 1.280000e+02 : f32
    %105 = vector.broadcast %cst_40 : f32 to vector<32x1xf32>
    %106 = arith.divf %104, %105 : vector<32x1xf32>
    %107 = vector.broadcast %106 : vector<32x1xf32> to vector<32x128xf32>
    %108 = arith.subf %100, %107 : vector<32x128xf32>
    %109 = arith.mulf %108, %108 : vector<32x128xf32>
    %cst_41 = arith.constant dense<0.000000e+00> : vector<32xf32>
    %110 = vector.multi_reduction <add>, %109, %cst_41 [1] : vector<32x128xf32> to vector<32xf32>
    %111 = vector.shape_cast %110 : vector<32xf32> to vector<32x1xf32>
    %cst_42 = arith.constant 1.280000e+02 : f32
    %112 = vector.broadcast %cst_42 : f32 to vector<32x1xf32>
    %113 = arith.divf %111, %112 : vector<32x1xf32>
    %cst_43 = arith.constant 9.99999974E-6 : f32
    %114 = vector.broadcast %cst_43 : f32 to vector<32x1xf32>
    %115 = arith.addf %113, %114 : vector<32x1xf32>
    %116 = math.rsqrt %115 : vector<32x1xf32>
    %117 = vector.broadcast %116 : vector<32x1xf32> to vector<32x128xf32>
    %118 = arith.mulf %108, %117 : vector<32x128xf32>
    %119 = vector.broadcast %101 : vector<1x128xf32> to vector<32x128xf32>
    %120 = arith.mulf %118, %119 : vector<32x128xf32>
    %121 = vector.broadcast %102 : vector<1x128xf32> to vector<32x128xf32>
    %122 = arith.addf %120, %121 : vector<32x128xf32>
    %123 = vector.shape_cast %122 : vector<32x128xf32> to vector<2x16x128xf32>
    %c0_44 = arith.constant 0 : index
    %c0_45 = arith.constant 0 : index
    %c0_46 = arith.constant 0 : index
    %124 = vector.load %arg13[%c0_44, %c0_45, %c0_46] : memref<2x16x128xf32, #tpu.memory_space<vmem>>, vector<2x16x128xf32>
    tpu.vector_store %arg13[%c0_44, %c0_45, %c0_46], %123 {strides = array<i32>} : memref<2x16x128xf32, #tpu.memory_space<vmem>>, vector<2x16x128xf32>,
    return
  }
  func.func @transform_0(%arg0: i32) -> (i32, i32, i32) {
    %c0_i32 = arith.constant 0 : i32
    %c0_i32_0 = arith.constant 0 : i32
    %c0_i32_1 = arith.constant 0 : i32
    return %arg0, %c0_i32, %c0_i32_0 : i32, i32, i32
  }
  func.func @transform_1(%arg0: i32) -> (i32, i32) {
    %c0_i32 = arith.constant 0 : i32
    %c0_i32_0 = arith.constant 0 : i32
    %c0_i32_1 = arith.constant 0 : i32
    return %c0_i32, %c0_i32_0 : i32, i32
  }
  func.func @transform_2(%arg0: i32) -> (i32, i32) {
    %c0_i32 = arith.constant 0 : i32
    %c0_i32_0 = arith.constant 0 : i32
    %c0_i32_1 = arith.constant 0 : i32
    return %c0_i32, %c0_i32_0 : i32, i32
  }
  func.func @transform_3(%arg0: i32) -> (i32, i32) {
    %c0_i32 = arith.constant 0 : i32
    %c0_i32_0 = arith.constant 0 : i32
    %c0_i32_1 = arith.constant 0 : i32
    return %c0_i32, %c0_i32_0 : i32, i32
  }
  func.func @transform_4(%arg0: i32) -> (i32, i32) {
    %c0_i32 = arith.constant 0 : i32
    %c0_i32_0 = arith.constant 0 : i32
    %c0_i32_1 = arith.constant 0 : i32
    return %c0_i32, %c0_i32_0 : i32, i32
  }
  func.func @transform_5(%arg0: i32) -> (i32, i32) {
    %c0_i32 = arith.constant 0 : i32
    %c0_i32_0 = arith.constant 0 : i32
    %c0_i32_1 = arith.constant 0 : i32
    return %c0_i32, %c0_i32_0 : i32, i32
  }
  func.func @transform_6(%arg0: i32) -> (i32, i32) {
    %c0_i32 = arith.constant 0 : i32
    %c0_i32_0 = arith.constant 0 : i32
    %c0_i32_1 = arith.constant 0 : i32
    return %c0_i32, %c0_i32_0 : i32, i32
  }
  func.func @transform_7(%arg0: i32) -> (i32, i32) {
    %c0_i32 = arith.constant 0 : i32
    %c0_i32_0 = arith.constant 0 : i32
    %c0_i32_1 = arith.constant 0 : i32
    return %c0_i32, %c0_i32_0 : i32, i32
  }
  func.func @transform_8(%arg0: i32) -> (i32, i32) {
    %c0_i32 = arith.constant 0 : i32
    %c0_i32_0 = arith.constant 0 : i32
    %c0_i32_1 = arith.constant 0 : i32
    return %c0_i32, %c0_i32_0 : i32, i32
  }
  func.func @transform_9(%arg0: i32) -> (i32, i32) {
    %c0_i32 = arith.constant 0 : i32
    %c0_i32_0 = arith.constant 0 : i32
    %c0_i32_1 = arith.constant 0 : i32
    return %c0_i32, %c0_i32_0 : i32, i32
  }
  func.func @transform_10(%arg0: i32) -> (i32, i32) {
    %c0_i32 = arith.constant 0 : i32
    %c0_i32_0 = arith.constant 0 : i32
    %c0_i32_1 = arith.constant 0 : i32
    return %c0_i32, %c0_i32_0 : i32, i32
  }
  func.func @transform_11(%arg0: i32) -> (i32, i32) {
    %c0_i32 = arith.constant 0 : i32
    %c0_i32_0 = arith.constant 0 : i32
    %c0_i32_1 = arith.constant 0 : i32
    return %c0_i32, %c0_i32_0 : i32, i32
  }
  func.func @transform_12(%arg0: i32) -> (i32, i32, i32) {
    %c0_i32 = arith.constant 0 : i32
    %c0_i32_0 = arith.constant 0 : i32
    %c0_i32_1 = arith.constant 0 : i32
    return %arg0, %c0_i32, %c0_i32_0 : i32, i32, i32
  }
}

</mosaic_0001>

<bundles_post_ra>
// kernel: tpu_custom_call.1
= control target key start
LH: loop header
LB: loop body
LE: loop exit
PB: predicated region body
PF: predicated region fallthrough
CT: control target
= control target key end

     0   :  { %17 = vsyncpa [#allocation3], 0  ;;  %s3965_s0 = inlined_call_operand.hbm [shape: f32[2,16,128], index: 0, kind: input, shape index: {}]   ;;  %s3966_s1 = inlined_call_operand.hbm [shape: bf16[128,384], index: 1, kind: input, shape index: {}]   ;;  %s3967_s2 = inlined_call_operand.hbm [shape: bf16[128,128], index: 2, kind: input, shape index: {}]   ;;  %s3968_s3 = inlined_call_operand.vmem [shape: f32[1,128], index: 3, kind: input, shape index: {}]   ;;  %s3969_s4 = inlined_call_operand.hbm [shape: bf16[128,512], index: 4, kind: input, shape index: {}]   ;;  %s3970_s5 = inlined_call_operand.vmem [shape: f32[1,512], index: 5, kind: input, shape index: {}]   ;;  %s3971_s6 = inlined_call_operand.hbm [shape: bf16[512,128], index: 6, kind: input, shape index: {}]   ;;  %s3972_s7 = inlined_call_operand.vmem [shape: f32[1,128], index: 7, kind: input, shape index: {}]   ;;  %s3973_s8 = inlined_call_operand.vmem [shape: f32[1,128], index: 8, kind: input, shape index: {}]   ;;  %s3974_s9 = inlined_call_operand.vmem [shape: f32[1,128], index: 9, kind: input, shape index: {}]   ;;  %s3975_s10 = inlined_call_operand.vmem [shape: f32[1,128], index: 10, kind: input, shape index: {}]   ;;  %s3976_s11 = inlined_call_operand.vmem [shape: f32[1,128], index: 11, kind: input, shape index: {}]   ;;  %s3977_s12 = inlined_call_operand.hbm [shape: f32[2,16,128], index: 12, kind: output, shape index: {}]  }
   0x1   :  { %18 = vsyncpa [#allocation6], 0 }
   0x2   :  { %19 = vsyncpa [#allocation9], 0 }
   0x3   :  { %20 = vsyncpa [#allocation4], 0  ;;  %s3368_s21 = smov [#allocation5]   ;;  %s3228_s25 = scalar_lea.hbm %s3966_s1, 3072 }
   0x4   :  { %s38_s22 = sshll.u32 %s3368_s21, 4  ;;  %p3229_p0 = scmp.ne.s32.totalorder %s3966_s1, %s3228_s25  ;;  %s39_s22 = int_to_ptr.vmem [resolvable:$true] %s38_s22 }
   0x5   :  { %p3232_p1 = scmp.lt.u32.totalorder %s3228_s25, %s3966_s1 }
   0x7   :  { %p3234_p2 = pnand %p3232_p1, %p3229_p0 }
   0x9   :  { %3237 = shalt.err (!%p3234_p2)
}
   0xa   :  { %s3238_s30 = scalar_lea.vmem %s39_s22, 3072  ;;  %p3243_p4 = scmp.lt.s32.totalorder %s39_s22, %s39_s22 }
   0xb   :  { %p3239_p3 = scmp.ne.s32.totalorder %s39_s22, %s3238_s30  ;;  %p3244_p5 = scmp.lt.s32.totalorder %s3238_s30, %s3238_s30 }
   0xd   :  { %p3245_p6 = por %p3244_p5, %p3243_p4 }
   0xf   :  { %p3246_p7 = pnand %p3245_p6, %p3239_p3 }
  0x11   :  { %3249 = shalt.err (!%p3246_p7)
}
  0x12   :  { %s3369_s13 = smov 192   ;;  %s3370_s14 = smov 12  }
  0x13   :  { %44 = dma.hbm_to_vmem [thread:$0]  %s3966_s1, 3072, %s39_s22, [#allocation6], %s3369_s13, %s3369_s13, %s3370_s14  }
  0x14   :  { %s3371_s17 = smov [#allocation8]   ;;  %s3250_s21 = scalar_lea.hbm %s3969_s4, 4096 }
  0x15   :  { %s64_s18 = sshll.u32 %s3371_s17, 4  ;;  %p3251_p8 = scmp.ne.s32.totalorder %s3969_s4, %s3250_s21  ;;  %s65_s18 = int_to_ptr.vmem [resolvable:$true] %s64_s18 }
  0x16   :  { %p3254_p9 = scmp.lt.u32.totalorder %s3250_s21, %s3969_s4 }
  0x18   :  { %p3256_p10 = pnand %p3254_p9, %p3251_p8 }
  0x1a   :  { %3259 = shalt.err (!%p3256_p10)
}
  0x1b   :  { %s3260_s27 = scalar_lea.vmem %s65_s18, 4096  ;;  %p3265_p12 = scmp.lt.s32.totalorder %s65_s18, %s65_s18 }
  0x1c   :  { %p3261_p11 = scmp.ne.s32.totalorder %s65_s18, %s3260_s27  ;;  %p3266_p13 = scmp.lt.s32.totalorder %s3260_s27, %s3260_s27 }
  0x1e   :  { %p3267_p0 = por %p3266_p13, %p3265_p12 }
  0x20   :  { %p3268_p1 = pnand %p3267_p0, %p3261_p11 }
  0x22   :  { %3271 = shalt.err (!%p3268_p1)
}
  0x23   :  { %s3372_s1 = smov 256   ;;  %s3373_s22 = smov 16  }
  0x24   :  { %70 = dma.hbm_to_vmem [thread:$0]  %s3969_s4, 4096, %s65_s18, [#allocation9], %s3372_s1, %s3372_s1, %s3373_s22  }
  0x25   :  { %s3374_s30 = smov [#allocation2]   ;;  %s3272_s16 = scalar_lea.hbm %s3965_s0, 512 }
  0x26   :  { %s26_s13 = sshll.u32 %s3374_s30, 4  ;;  %p3273_p2 = scmp.ne.s32.totalorder %s3965_s0, %s3272_s16  ;;  %s27_s13 = int_to_ptr.vmem [resolvable:$true] %s26_s13 }
  0x27   :  { %p3276_p3 = scmp.lt.u32.totalorder %s3272_s16, %s3965_s0 }
  0x29   :  { %p3278_p4 = pnand %p3276_p3, %p3273_p2 }
  0x2b   :  { %3281 = shalt.err (!%p3278_p4)
}
  0x2c   :  { %s3282_s23 = scalar_lea.vmem %s27_s13, 512  ;;  %p3287_p6 = scmp.lt.s32.totalorder %s27_s13, %s27_s13 }
  0x2d   :  { %p3283_p5 = scmp.ne.s32.totalorder %s27_s13, %s3282_s23  ;;  %p3288_p7 = scmp.lt.s32.totalorder %s3282_s23, %s3282_s23 }
  0x2f   :  { %p3289_p8 = por %p3288_p7, %p3287_p6 }
  0x31   :  { %p3290_p9 = pnand %p3289_p8, %p3283_p5 }
  0x33   :  { %3293 = shalt.err (!%p3290_p9)
}
  0x34   :  { %s3375_s4 = smov 128   ;;  %s3376_s18 = smov 8  }
  0x35   :  { %32 = dma.hbm_to_vmem [thread:$0]  %s3965_s0, 512, %s27_s13, [#allocation3], %s3375_s4, %s3375_s4, %s3376_s18  }
  0x36   :  { %s3377_s26 = smov [#allocation7]   ;;  %s3294_s28 = scalar_lea.hbm %s3967_s2, 1024 }
  0x37   :  { %s50_s27 = sshll.u32 %s3377_s26, 4  ;;  %p3295_p10 = scmp.ne.s32.totalorder %s3967_s2, %s3294_s28  ;;  %s51_s27 = int_to_ptr.vmem [resolvable:$true] %s50_s27 }
  0x38   :  { %p3298_p11 = scmp.lt.u32.totalorder %s3294_s28, %s3967_s2 }
  0x3a   :  { %p3300_p12 = pnand %p3298_p11, %p3295_p10 }
  0x3c   :  { %3303 = shalt.err (!%p3300_p12)
}
  0x3d   :  { %s3304_s16 = scalar_lea.vmem %s51_s27, 1024  ;;  %p3309_p0 = scmp.lt.s32.totalorder %s51_s27, %s51_s27 }
  0x3e   :  { %p3305_p13 = scmp.ne.s32.totalorder %s51_s27, %s3304_s16  ;;  %p3310_p1 = scmp.lt.s32.totalorder %s3304_s16, %s3304_s16 }
  0x40   :  { %p3311_p2 = por %p3310_p1, %p3309_p0 }
  0x42   :  { %p3312_p3 = pnand %p3311_p2, %p3305_p13 }
  0x44   :  { %3315 = shalt.err (!%p3312_p3)
}
  0x45   :  { %s3378_s0 = smov 64   ;;  %s3379_s13 = smov 4  }
  0x46   :  { %56 = dma.hbm_to_vmem [thread:$0]  %s3967_s2, 1024, %s51_s27, [#allocation6], %s3378_s0, %s3378_s0, %s3379_s13  }
  0x47   :  { %s3380_s20 = smov [#allocation10]   ;;  %s3316_s25 = scalar_lea.hbm %s3971_s6, 4096 }
  0x48   :  { %s78_s21 = sshll.u32 %s3380_s20, 4  ;;  %p3317_p4 = scmp.ne.s32.totalorder %s3971_s6, %s3316_s25  ;;  %s79_s21 = int_to_ptr.vmem [resolvable:$true] %s78_s21 }
  0x49   :  { %p3320_p5 = scmp.lt.u32.totalorder %s3316_s25, %s3971_s6 }
  0x4b   :  { %p3322_p6 = pnand %p3320_p5, %p3317_p4 }
  0x4d   :  { %3325 = shalt.err (!%p3322_p6)
}
  0x4e   :  { %s3326_s29 = scalar_lea.vmem %s79_s21, 4096  ;;  %p3331_p8 = scmp.lt.s32.totalorder %s79_s21, %s79_s21 }
  0x4f   :  { %p3327_p7 = scmp.ne.s32.totalorder %s79_s21, %s3326_s29  ;;  %p3332_p9 = scmp.lt.s32.totalorder %s3326_s29, %s3326_s29 }
  0x51   :  { %p3333_p10 = por %p3332_p9, %p3331_p8 }
  0x53   :  { %p3334_p11 = pnand %p3333_p10, %p3327_p7 }
  0x55   :  { %3337 = shalt.err (!%p3334_p11)
}
  0x56   :  { %84 = dma.hbm_to_vmem [thread:$0]  %s3971_s6, 4096, %s79_s21, [#allocation9], %s3378_s0, %s3378_s0, %s3379_s13  }
  0x57   :  { %3360 = dma.done.wait [#allocation3], 512  }
  0x58   :  { %3361 = vsyncadd [#allocation3], 4294966784 }
  0x59   :  { %3362 = dma.done.wait [#allocation6], 4096  }
  0x5a   :  { %3363 = vsyncadd [#allocation6], 4294963200 }
  0x5b   :  { %3364 = dma.done.wait [#allocation9], 8192  }
  0x5c   :  { %3365 = vsyncadd [#allocation9], 4294959104  ;;  %v3381_v0 = vmov 0   ;;  %v3024_v1 = vld [vmem:[#allocation5 + $0x4] ss:$12 sps:$4 sm:$0xff]   ;;  %v112_v11 = vld [vmem:[#allocation2 + $0x8] sm:$0xff] }
  0x5d   :  { %309 = vmatprep.mubr.bf16.mxu0 %v3381_v0  ;;  %v3026_v2 = vld [vmem:[#allocation5] ss:$12 sps:$4 sm:$0xff]   ;;  %277 = vmatprep.subr.bf16.mxu0 %v3024_v1  ;;  %v3027_v3 = vld [vmem:[#allocation5 + $0x1c] ss:$12 sps:$4 sm:$0xff]   ;;  %v3029_v4 = vld [vmem:[#allocation5 + $0x18] ss:$12 sps:$4 sm:$0xff]  }
  0x5e   :  { %278 = vmatpush1.bf16.msra.mxu0 %v3026_v2  ;;  %v3030_v5 = vld [vmem:[#allocation5 + $0x34] ss:$12 sps:$4 sm:$0xff]   ;;  %v3032_v6 = vld [vmem:[#allocation5 + $0x30] ss:$12 sps:$4 sm:$0xff]   ;;  %v3033_v7 = vld [vmem:[#allocation5 + $0x4c] ss:$12 sps:$4 sm:$0xff]  }
  0x5f   :  { %279 = vmatprep.subr.bf16.mxu0 %v3027_v3  ;;  %v111_v8 = vld [vmem:[#allocation2] sm:$0xff]  ;;  %v3035_v9 = vld [vmem:[#allocation5 + $0x48] ss:$12 sps:$4 sm:$0xff]   ;;  %v3051_v20 = vld [vmem:[#allocation5 + $0x50] ss:$12 sps:$4 sm:$0xff]   ;;  %v3382_v31 = vmov 0.0  }
  0x60   :  { %v3036_v10 = vld [vmem:[#allocation5 + $0x64] ss:$12 sps:$4 sm:$0xff]   ;;  %v115_v12 = vpack.c.bf16 %v112_v11, %v111_v8  ;;  %v3048_v13 = vld [vmem:[#allocation5 + $0x8] ss:$12 sps:$4 sm:$0xff]   ;;  %v3049_v14 = vld [vmem:[#allocation5 + $0x20] ss:$12 sps:$4 sm:$0xff]  }
  0x61   :  { %v3038_v15 = vld [vmem:[#allocation5 + $0x60] ss:$12 sps:$4 sm:$0xff]   ;;  %2749 = vmatprep.subr.bf16.mxu1 %v3048_v13  ;;  %v3039_v16 = vld [vmem:[#allocation5 + $0x7c] ss:$12 sps:$4 sm:$0xff]   ;;  %v3050_v17 = vld [vmem:[#allocation5 + $0x38] ss:$12 sps:$4 sm:$0xff]  }
  0x62   :  { %280 = vmatpush1.bf16.msra.mxu0 %v3029_v4  ;;  %2765 = vmatprep.mubr.bf16.mxu1 %v115_v12  ;;  %v3041_v18 = vld [vmem:[#allocation5 + $0x78] ss:$12 sps:$4 sm:$0xff]   ;;  %v3042_v19 = vld [vmem:[#allocation5 + $0x94] ss:$12 sps:$4 sm:$0xff]   ;;  %v3044_v21 = vld [vmem:[#allocation5 + $0x90] ss:$12 sps:$4 sm:$0xff]  }
  0x63   :  { %281 = vmatprep.subr.bf16.mxu0 %v3030_v5  ;;  %2750 = vmatpush3.bf16.msra.mxu1 %v3048_v13  ;;  %v3045_v22 = vld [vmem:[#allocation5 + $0xac] ss:$12 sps:$4 sm:$0xff]   ;;  %v3052_v23 = vld [vmem:[#allocation5 + $0x68] ss:$12 sps:$4 sm:$0xff]   ;;  %v3055_v29 = vld [vmem:[#allocation5 + $0xb0] ss:$12 sps:$4 sm:$0xff]  }
  0x64   :  { %2751 = vmatprep.subr.bf16.mxu1 %v3049_v14  ;;  %v3047_v24 = vld [vmem:[#allocation5 + $0xa8] ss:$12 sps:$4 sm:$0xff]   ;;  %v3053_v25 = vld [vmem:[#allocation5 + $0x80] ss:$12 sps:$4 sm:$0xff]   ;;  %v3054_v26 = vld [vmem:[#allocation5 + $0x98] ss:$12 sps:$4 sm:$0xff]  }
  0x65   :  { %v113_v27 = vld [vmem:[#allocation2 + $0x10] sm:$0xff]  ;;  %v114_v28 = vld [vmem:[#allocation2 + $0x18] sm:$0xff]  ;;  %vm3383_vm0 = vmmov 0   ;;  %vm534_vm1 = vcmask 261120   ;;  %s3384_s6 = smov 96   ;;  %s3385_s30 = smov 32  }
  0x66   :  { %282 = vmatpush1.bf16.msra.mxu0 %v3032_v6  ;;  %v116_v30 = vpack.c.bf16 %v114_v28, %v113_v27  ;;  %vm931_vm3 = vcmask 130048   ;;  %vm1520_vm5 = vcmask 523264   ;;  %vm1525_vm6 = vcmask 785408   ;;  %s3386_s23 = smov [#allocation11]  }
  0x67   :  { %283 = vmatprep.subr.bf16.mxu0 %v3033_v7  ;;  %2752 = vmatpush3.bf16.msra.mxu1 %v3049_v14 }
  0x68   :  { %2753 = vmatprep.subr.bf16.mxu1 %v3050_v17 }
  0x6a   :  { %284 = vmatpush1.bf16.msra.mxu0 %v3035_v9 }
  0x6b   :  { %285 = vmatprep.subr.bf16.mxu0 %v3036_v10  ;;  %2754 = vmatpush3.bf16.msra.mxu1 %v3050_v17 }
  0x6c   :  { %2755 = vmatprep.subr.bf16.mxu1 %v3051_v20 }
  0x6e   :  { %286 = vmatpush1.bf16.msra.mxu0 %v3038_v15 }
  0x6f   :  { %287 = vmatprep.subr.bf16.mxu0 %v3039_v16  ;;  %2756 = vmatpush3.bf16.msra.mxu1 %v3051_v20 }
  0x70   :  { %2757 = vmatprep.subr.bf16.mxu1 %v3052_v23 }
  0x72   :  { %288 = vmatpush1.bf16.msra.mxu0 %v3041_v18 }
  0x73   :  { %289 = vmatprep.subr.bf16.mxu0 %v3042_v19  ;;  %2758 = vmatpush3.bf16.msra.mxu1 %v3052_v23 }
  0x74   :  { %2759 = vmatprep.subr.bf16.mxu1 %v3053_v25 }
  0x76   :  { %290 = vmatpush1.bf16.msra.mxu0 %v3044_v21 }
  0x77   :  { %291 = vmatprep.subr.bf16.mxu0 %v3045_v22  ;;  %2760 = vmatpush3.bf16.msra.mxu1 %v3053_v25 }
  0x78   :  { %2761 = vmatprep.subr.bf16.mxu1 %v3054_v26 }
  0x7a   :  { %292 = vmatpush1.bf16.msra.mxu0 %v3047_v24 }
  0x7b   :  { %2762 = vmatpush3.bf16.msra.mxu1 %v3054_v26  ;;  %2769 = vmatprep.subr.bf16.mxu0 %v3382_v31 }
  0x7c   :  { %2763 = vmatprep.subr.bf16.mxu1 %v3055_v29 }
  0x7d   :  { %310 = vmatmul.mubr.bf16.vlgmr.msra.gmra.mrb[0].mxu0 %v115_v12 }
  0x7e   :  { %319 = vmatprep.mubr.bf16.mxu0 %v3381_v0 }
  0x7f   :  { %2764 = vmatpush3.bf16.msra.mxu1 %v3055_v29 }
  0x80   :  { %2781 = vmatprep.subr.bf16.mxu1 %v3382_v31 }
  0x82   :  { %2766 = vmatmul.mubr.bf16.vlgmr.msra.gmra.mrb[0].mxu1 %v116_v30 }
  0x83   :  { %2783 = vmatprep.mubr.msk.bf16.mxu1 %vm3383_vm0, %v3382_v31 }
  0x85   :  { %320 = vmatmul.mubr.bf16.gmra.mrb[4].mxu0 %v116_v30 }
  0x86   :  { %2771 = vmatprep.mubr.msk.bf16.mxu0 %vm3383_vm0, %v3382_v31 }
 0x150   :  { %v311_v32 = vpop.f32.mrb[0].mxu0 }
 0x151   :  { %v313_v33 = vpop.f32.mrb[1].mxu0  ;;  %v379_v35 = vmul.f32 0.17677669, %v311_v32 }
 0x152   :  { %v315_v34 = vpop.f32.mrb[2].mxu0 }
 0x153   :  { %v380_v36 = vmul.f32 0.17677669, %v315_v34  ;;  %v317_v37 = vpop.f32.mrb[3].mxu0 }
 0x154   :  { %v2904_v38 = vpack.i.bf16 %v317_v37, %v313_v33  ;;  %v471_v39 = vpack.c.bf16 %v317_v37, %v313_v33 }
 0x155   :  { %v423_v40 = vpack.c.bf16 %v380_v36, %v379_v35  ;;  %v2914_v41 = vpack.i.bf16 %v380_v36, %v379_v35  ;;  %v3548_v54 = vpop.f32.mrb[0].mxu1 }
 0x156   :  { %2905 = vrot.lane.b32.xlu0 %v2904_v38, %s3384_s6  ;;  %v539_v42 = vsel %vm534_vm1, %v471_v39, 0  ;;  %v3551_v55 = vpop.f32.mrb[1].mxu1 }
 0x157   :  { %2915 = vrot.lane.b32.xlu1 %v2914_v41, %s3384_s6  ;;  %2770 = vmatpush3.bf16.xpose.msra.mxu0 %v539_v42  ;;  %v3553_v56 = vpop.f32.mrb[2].mxu1 }
 0x158   :  { %v321_v43 = vpop.f32.mrb[4].mxu0  ;;  %2775 = vmatprep.subr.bf16.mxu0 %v3382_v31  ;;  %v520_v57 = vpack.c.bf16 %v3553_v56, %v3548_v54  ;;  %v3557_v58 = vpop.f32.mrb[3].mxu1 }
 0x159   :  { %v323_v44 = vpop.f32.mrb[5].mxu0  ;;  %v381_v46 = vmul.f32 0.17677669, %v321_v43  ;;  %v519_v59 = vpack.c.bf16 %v3557_v58, %v3551_v55  ;;  %v3563_v60 = vpack.i.bf16 %v3557_v58, %v3551_v55  ;;  %v527_v55 = vlaneseq }
 0x15a   :  { %v325_v45 = vpop.f32.mrb[6].mxu0 }
 0x15b   :  { %v382_v47 = vmul.f32 0.17677669, %v325_v45  ;;  %2920 = vrot.lane.b32.xlu1 %v2904_v38, %s3378_s0  ;;  %v327_v48 = vpop.f32.mrb[7].mxu0  ;;  %v3609_v58 = vshrl.u32 %v527_v55, 7 }
 0x15c   :  { %v2909_v49 = vpack.i.bf16 %v327_v48, %v323_v44  ;;  %v472_v50 = vpack.c.bf16 %v327_v48, %v323_v44 }
 0x15d   :  { %v424_v51 = vpack.c.bf16 %v382_v47, %v381_v46  ;;  %v2929_v52 = vpack.i.bf16 %v382_v47, %v381_v46 }
 0x15e   :  { %2772 = vmatmul.mubr.msk.bf16.vlgmr.msra.gmra.mrb[8].mxu0 %vm534_vm1, %v423_v40  ;;  %2910 = vrot.lane.b32.xlu0 %v2909_v49, %s3384_s6  ;;  %v586_v53 = vsel %vm534_vm1, %v472_v50, 0 }
 0x15f   :  { %2925 = vrot.lane.b32.xlu1 %v2909_v49, %s3378_s0  ;;  %2776 = vmatpush3.bf16.xpose.msra.mxu0 %v586_v53  ;;  %v3607_v53 = vpack.i.bf16 %v3553_v56, %v3548_v54 }
 0x160   :  { %2777 = vmatprep.mubr.msk.bf16.mxu0 %vm3383_vm0, %v3382_v31  ;;  %2787 = vmatprep.subr.bf16.mxu0 %v3382_v31 }
 0x162   :  { %2930 = vrot.lane.b32.xlu0 %v2929_v52, %s3384_s6 }
 0x163   :  { %2940 = vrot.lane.b32.xlu1 %v2904_v38, %s3385_s30 }
 0x166   :  { %2935 = vrot.lane.b32.xlu0 %v2914_v41, %s3378_s0  ;;  %2778 = vmatmul.mubr.msk.bf16.vlgmr.msra.gmra.mrb[12].mxu0 %vm534_vm1, %v424_v51 }
 0x167   :  { %2950 = vrot.lane.b32.xlu1 %v2909_v49, %s3385_s30  ;;  %2789 = vmatprep.mubr.msk.bf16.mxu0 %vm3383_vm0, %v3382_v31 }
 0x16a   :  { %2945 = vrot.lane.b32.xlu0 %v2929_v52, %s3378_s0 }
 0x16b   :  { %2960 = vrot.lane.b32.xlu1 %v2929_v52, %s3385_s30 }
 0x16e   :  { %2955 = vrot.lane.b32.xlu0 %v2914_v41, %s3385_s30 }
 0x16f   :  { %2965 = vrot.lane.b32.xlu1 %v3563_v60, %s3384_s6 }
 0x1c8   :  { %v2906_v61 = vpop.permute.xlu0 %2905 }
 0x1c9   :  { %v2908_v62 = vunpack.i.h.bf16 %v2906_v61  ;;  %v2907_v63 = vunpack.i.l.bf16 %v2906_v61  ;;  %v2916_v1 = vpop.permute.xlu1 %2915  ;;  %v529_v61 = vadd.s32 8, %v3609_v58 }
 0x1ca   :  { %v2918_v7 = vunpack.i.h.bf16 %v2916_v1  ;;  %v2917_v8 = vunpack.i.l.bf16 %v2916_v1 }
 0x1cb   :  { %v473_v2 = vpack.c.bf16 %v2908_v62, %v2907_v63 }
 0x1cc   :  { %v425_v14 = vpack.c.bf16 %v2918_v7, %v2917_v8 }
 0x1cd   :  { %v2921_v3 = vpop.permute.xlu1 %2920  ;;  %v633_v4 = vsel %vm534_vm1, %v473_v2, 0 }
 0x1ce   :  { %v2923_v5 = vunpack.i.h.bf16 %v2921_v3  ;;  %v2922_v6 = vunpack.i.l.bf16 %v2921_v3  ;;  %2782 = vmatpush3.bf16.xpose.msra.mxu1 %v633_v4 }
 0x1cf   :  { %2793 = vmatprep.subr.bf16.mxu1 %v3382_v31 }
 0x1d0   :  { %v2911_v9 = vpop.permute.xlu0 %2910  ;;  %v475_v10 = vpack.c.bf16 %v2923_v5, %v2922_v6 }
 0x1d1   :  { %v2913_v11 = vunpack.i.h.bf16 %v2911_v9  ;;  %v2912_v12 = vunpack.i.l.bf16 %v2911_v9  ;;  %v2926_v13 = vpop.permute.xlu1 %2925 }
 0x1d2   :  { %v2928_v17 = vunpack.i.h.bf16 %v2926_v13  ;;  %v2927_v18 = vunpack.i.l.bf16 %v2926_v13  ;;  %v727_v21 = vsel %vm534_vm1, %v475_v10, 0 }
 0x1d3   :  { %v474_v15 = vpack.c.bf16 %v2913_v11, %v2912_v12 }
 0x1d4   :  { %v2931_v16 = vpop.permute.xlu0 %2930  ;;  %v476_v27 = vpack.c.bf16 %v2928_v17, %v2927_v18 }
 0x1d5   :  { %2784 = vmatmul.mubr.msk.bf16.vlgmr.msra.gmra.mrb[4].mxu1 %vm534_vm1, %v425_v14  ;;  %v2941_v19 = vpop.permute.xlu1 %2940  ;;  %v680_v20 = vsel %vm534_vm1, %v474_v15, 0  ;;  %v2933_v24 = vunpack.i.h.bf16 %v2931_v16  ;;  %v2932_v25 = vunpack.i.l.bf16 %v2931_v16 }
 0x1d6   :  { %v2943_v22 = vunpack.i.h.bf16 %v2941_v19  ;;  %v2942_v23 = vunpack.i.l.bf16 %v2941_v19  ;;  %2788 = vmatpush3.bf16.xpose.msra.mxu0 %v680_v20  ;;  %2794 = vmatpush3.bf16.xpose.msra.mxu1 %v727_v21  ;;  %v774_v38 = vsel %vm534_vm1, %v476_v27, 0 }
 0x1d7   :  { %2795 = vmatprep.mubr.msk.bf16.mxu1 %vm3383_vm0, %v3382_v31  ;;  %2805 = vmatprep.subr.bf16.mxu1 %v3382_v31  ;;  %v426_v33 = vpack.c.bf16 %v2933_v24, %v2932_v25 }
 0x1d8   :  { %v2936_v26 = vpop.permute.xlu0 %2935  ;;  %2799 = vmatprep.subr.bf16.mxu0 %v3382_v31  ;;  %v477_v28 = vpack.c.bf16 %v2943_v22, %v2942_v23 }
 0x1d9   :  { %v2938_v29 = vunpack.i.h.bf16 %v2936_v26  ;;  %v2937_v30 = vunpack.i.l.bf16 %v2936_v26  ;;  %v2951_v32 = vpop.permute.xlu1 %2950 }
 0x1da   :  { %v2953_v36 = vunpack.i.h.bf16 %v2951_v32  ;;  %v2952_v37 = vunpack.i.l.bf16 %v2951_v32  ;;  %v821_v39 = vsel %vm534_vm1, %v477_v28, 0 }
 0x1db   :  { %v427_v34 = vpack.c.bf16 %v2938_v29, %v2937_v30 }
 0x1dc   :  { %v2946_v35 = vpop.permute.xlu0 %2945  ;;  %v478_v43 = vpack.c.bf16 %v2953_v36, %v2952_v37 }
 0x1dd   :  { %2790 = vmatmul.mubr.msk.bf16.vlgmr.msra.gmra.mrb[16].mxu0 %vm534_vm1, %v426_v33  ;;  %2796 = vmatmul.mubr.msk.bf16.vlgmr.msra.gmra.mrb[8].mxu1 %vm534_vm1, %v427_v34  ;;  %v2948_v40 = vunpack.i.h.bf16 %v2946_v35  ;;  %v2947_v41 = vunpack.i.l.bf16 %v2946_v35  ;;  %v2961_v48 = vpop.permute.xlu1 %2960 }
 0x1de   :  { %2800 = vmatpush3.bf16.xpose.msra.mxu0 %v774_v38  ;;  %2806 = vmatpush3.bf16.xpose.msra.mxu1 %v821_v39  ;;  %v868_v49 = vsel %vm534_vm1, %v478_v43, 0  ;;  %v2963_v50 = vunpack.i.h.bf16 %v2961_v48  ;;  %v2962_v51 = vunpack.i.l.bf16 %v2961_v48 }
 0x1df   :  { %2801 = vmatprep.mubr.msk.bf16.mxu0 %vm3383_vm0, %v3382_v31  ;;  %2807 = vmatprep.mubr.msk.bf16.mxu1 %vm3383_vm0, %v3382_v31  ;;  %v428_v46 = vpack.c.bf16 %v2948_v40, %v2947_v41 }
 0x1e0   :  { %v2956_v42 = vpop.permute.xlu0 %2955  ;;  %2811 = vmatprep.subr.bf16.mxu0 %v3382_v31  ;;  %2817 = vmatprep.subr.bf16.mxu1 %v3382_v31  ;;  %v430_v52 = vpack.c.bf16 %v2963_v50, %v2962_v51 }
 0x1e1   :  { %v2958_v44 = vunpack.i.h.bf16 %v2956_v42  ;;  %v2957_v45 = vunpack.i.l.bf16 %v2956_v42  ;;  %v3721_v62 = vpop.permute.xlu1 %2965 }
 0x1e3   :  { %v429_v47 = vpack.c.bf16 %v2958_v44, %v2957_v45 }
 0x1e5   :  { %2802 = vmatmul.mubr.msk.bf16.vlgmr.msra.gmra.mrb[20].mxu0 %vm534_vm1, %v428_v46  ;;  %2808 = vmatmul.mubr.msk.bf16.vlgmr.msra.gmra.mrb[12].mxu1 %vm534_vm1, %v429_v47 }
 0x1e6   :  { %2812 = vmatpush3.bf16.xpose.msra.mxu0 %v868_v49  ;;  %2813 = vmatprep.mubr.msk.bf16.mxu0 %vm3383_vm0, %v3382_v31 }
 0x1e7   :  { %2823 = vmatprep.subr.bf16.mxu0 %v3382_v31  ;;  %2818 = vmatpush3.bf16.msra.mxu1 %v519_v59  ;;  %v531_v59 = vand.u32 127, %v527_v55 }
 0x1e8   :  { %2819 = vmatprep.mubr.msk.bf16.mxu1 %vm3383_vm0, %v3382_v31  ;;  %2829 = vmatprep.subr.bf16.mxu1 %v3382_v31 }
 0x1e9   :  { %vm3613_vm2 = vcmp.ge.s32.totalorder %v3609_v58, %v531_v59  ;;  %vm3617_vm4 = vcmp.ge.s32.totalorder %v529_v61, %v531_v59 }
 0x1ed   :  { %2814 = vmatmul.mubr.msk.bf16.vlgmr.msra.gmra.mrb[24].mxu0 %vm534_vm1, %v430_v52 }
 0x1ee   :  { %2824 = vmatpush3.bf16.msra.mxu0 %v520_v57  ;;  %2825 = vmatprep.mubr.msk.bf16.mxu0 %vm3383_vm0, %v3382_v31 }
 0x1ef   :  { %2835 = vmatprep.subr.bf16.mxu0 %v3382_v31 }
 0x231   :  { %v575_v57 = vpop.f32.mrb[8].mxu0 }
 0x232   :  { %v3623_v54 = vsel %vm3613_vm2, %v575_v57, -1e+30  ;;  %v2773_v56 = vpop.f32.mrb[9].mxu0 }
 0x233   :  { %v578_v1 = vpop.f32.mrb[10].mxu0  ;;  %v932_v2 = vsel %vm931_vm3, %v3623_v54, -inf }
 0x234   :  { %v3629_v3 = vsel %vm3617_vm4, %v578_v1, -1e+30  ;;  %933 = vmax.xlane.f32.xlu0 %v932_v2  ;;  %v2774_v4 = vpop.f32.mrb[11].mxu0 }
 0x235   :  { %v935_v5 = vsel %vm931_vm3, %v3629_v3, -inf }
 0x236   :  { %936 = vmax.xlane.f32.xlu1 %v935_v5 }
 0x239   :  { %v622_v6 = vpop.f32.mrb[12].mxu0 }
 0x23a   :  { %v3635_v7 = vsel %vm3613_vm2, %v622_v6, -1e+30  ;;  %v2779_v8 = vpop.f32.mrb[13].mxu0 }
 0x23b   :  { %v625_v9 = vpop.f32.mrb[14].mxu0  ;;  %v938_v10 = vsel %vm931_vm3, %v3635_v7, -inf }
 0x23c   :  { %v3641_v11 = vsel %vm3617_vm4, %v625_v9, -1e+30  ;;  %939 = vmax.xlane.f32.xlu0 %v938_v10  ;;  %v2780_v12 = vpop.f32.mrb[15].mxu0 }
 0x23d   :  { %v941_v13 = vsel %vm931_vm3, %v3641_v11, -inf }
 0x240   :  { %942 = vmax.xlane.f32.xlu0 %v941_v13 }
 0x2a8   :  { %v669_v14 = vpop.f32.mrb[4].mxu1 }
 0x2a9   :  { %v3647_v15 = vsel %vm3613_vm2, %v669_v14, -1e+30  ;;  %v2785_v16 = vpop.f32.mrb[5].mxu1 }
 0x2aa   :  { %v672_v17 = vpop.f32.mrb[6].mxu1  ;;  %v944_v18 = vsel %vm931_vm3, %v3647_v15, -inf }
 0x2ab   :  { %v3653_v19 = vsel %vm3617_vm4, %v672_v17, -1e+30  ;;  %v2786_v20 = vpop.f32.mrb[7].mxu1  ;;  %945 = vmax.xlane.f32.xlu1 %v944_v18 }
 0x2ac   :  { %v947_v21 = vsel %vm931_vm3, %v3653_v19, -inf }
 0x2ad   :  { %948 = vmax.xlane.f32.xlu0 %v947_v21 }
 0x2b0   :  { %v716_v22 = vpop.f32.mrb[16].mxu0  ;;  %v763_v23 = vpop.f32.mrb[8].mxu1 }
 0x2b1   :  { %v3659_v24 = vsel %vm3613_vm2, %v716_v22, -1e+30  ;;  %v2791_v25 = vpop.f32.mrb[17].mxu0  ;;  %v2797_v26 = vpop.f32.mrb[9].mxu1  ;;  %v3665_v30 = vsel %vm3613_vm2, %v763_v23, -1e+30 }
 0x2b2   :  { %v719_v27 = vpop.f32.mrb[18].mxu0  ;;  %v766_v28 = vpop.f32.mrb[10].mxu1  ;;  %v950_v29 = vsel %vm931_vm3, %v3659_v24, -inf  ;;  %v956_v37 = vsel %vm931_vm3, %v3665_v30, -inf }
 0x2b3   :  { %v3669_v32 = vsel %vm3617_vm4, %v719_v27, -1e+30  ;;  %v2798_v33 = vpop.f32.mrb[11].mxu1  ;;  %951 = vmax.xlane.f32.xlu1 %v950_v29  ;;  %v2792_v34 = vpop.f32.mrb[19].mxu0  ;;  %v3675_v36 = vsel %vm3617_vm4, %v766_v28, -1e+30 }
 0x2b4   :  { %v953_v35 = vsel %vm931_vm3, %v3669_v32, -inf  ;;  %v959_v40 = vsel %vm931_vm3, %v3675_v36, -inf }
 0x2b5   :  { %954 = vmax.xlane.f32.xlu0 %v953_v35 }
 0x2b7   :  { %957 = vmax.xlane.f32.xlu1 %v956_v37 }
 0x2b8   :  { %v810_v38 = vpop.f32.mrb[20].mxu0  ;;  %v857_v39 = vpop.f32.mrb[12].mxu1 }
 0x2b9   :  { %v3683_v41 = vsel %vm3613_vm2, %v810_v38, -1e+30  ;;  %v2809_v42 = vpop.f32.mrb[13].mxu1  ;;  %960 = vmax.xlane.f32.xlu0 %v959_v40  ;;  %v2803_v43 = vpop.f32.mrb[21].mxu0  ;;  %v3689_v47 = vsel %vm3613_vm2, %v857_v39, -1e+30 }
 0x2ba   :  { %v813_v44 = vpop.f32.mrb[22].mxu0  ;;  %v860_v45 = vpop.f32.mrb[14].mxu1  ;;  %v962_v46 = vsel %vm931_vm3, %v3683_v41, -inf  ;;  %v968_v55 = vsel %vm931_vm3, %v3689_v47, -inf }
 0x2bb   :  { %v3693_v48 = vsel %vm3617_vm4, %v813_v44, -1e+30  ;;  %v2810_v49 = vpop.f32.mrb[15].mxu1  ;;  %963 = vmax.xlane.f32.xlu1 %v962_v46  ;;  %v2804_v50 = vpop.f32.mrb[23].mxu0  ;;  %v3699_v52 = vsel %vm3617_vm4, %v860_v45, -1e+30 }
 0x2bc   :  { %v965_v51 = vsel %vm931_vm3, %v3693_v48, -inf  ;;  %v971_v61 = vsel %vm931_vm3, %v3699_v52, -inf }
 0x2bd   :  { %966 = vmax.xlane.f32.xlu0 %v965_v51 }
 0x2bf   :  { %969 = vmax.xlane.f32.xlu1 %v968_v55 }
 0x2c0   :  { %v904_v59 = vpop.f32.mrb[24].mxu0 }
 0x2c1   :  { %v3707_v57 = vsel %vm3613_vm2, %v904_v59, -1e+30  ;;  %972 = vmax.xlane.f32.xlu0 %v971_v61  ;;  %v2815_v56 = vpop.f32.mrb[25].mxu0  ;;  %v934_v8 = vpop.xlane.xlu0 %933 }
 0x2c2   :  { %v907_v1 = vpop.f32.mrb[26].mxu0  ;;  %v974_v2 = vsel %vm931_vm3, %v3707_v57, -inf  ;;  %v980_v13 = vsub.f32 %v3623_v54, %v934_v8 }
 0x2c3   :  { %v3713_v4 = vsel %vm3617_vm4, %v907_v1, -1e+30  ;;  %975 = vmax.xlane.f32.xlu1 %v974_v2  ;;  %v2816_v5 = vpop.f32.mrb[27].mxu0  ;;  %v937_v9 = vpop.xlane.xlu1 %936 }
 0x2c4   :  { %v977_v6 = vsel %vm931_vm3, %v3713_v4, -inf  ;;  %v981_v10 = vsub.f32 %v3629_v3, %v937_v9  ;;  %v996_v17 = vmul.f32 1.442695, %v980_v13 }
 0x2c5   :  { %978 = vmax.xlane.f32.xlu0 %v977_v6 }
 0x2c6   :  { %v998_v14 = vmul.f32 1.442695, %v981_v10 }
 0x2c8   :  { %3144 = vpow2.f32 %v998_v14 }
 0x2c9   :  { %v940_v63 = vpop.xlane.xlu0 %939  ;;  %3146 = vpow2.f32 %v996_v17 }
 0x2ca   :  { %v982_v18 = vsub.f32 %v3635_v7, %v940_v63 }
 0x2cc   :  { %v1000_v21 = vmul.f32 1.442695, %v982_v18 }
 0x2cd   :  { %v943_v12 = vpop.xlane.xlu0 %942 }
 0x2ce   :  { %v983_v16 = vsub.f32 %v3641_v11, %v943_v12 }
 0x2d0   :  { %v1002_v20 = vmul.f32 1.442695, %v983_v16 }
 0x2d2   :  { %3148 = vpow2.f32 %v1002_v20  ;;  %v3729_v22 = vpop.eup %3144 }
 0x2d3   :  { %3150 = vpow2.f32 %v1000_v21  ;;  %v3731_v23 = vpop.eup %3146  ;;  %v1031_v3 = vsel %vm931_vm3, %v3729_v22, 0.0 }
 0x2d4   :  { %2975 = vrot.lane.b32.xlu1 %v3563_v60, %s3378_s0  ;;  %v1028_v11 = vsel %vm931_vm3, %v3731_v23, 0.0 }
 0x2d8   :  { %2980 = vrot.lane.b32.xlu1 %v3607_v53, %s3378_s0 }
 0x2db   :  { %2970 = vrot.lane.b32.xlu0 %v3607_v53, %s3384_s6 }
 0x2dc   :  { %v3735_v54 = vpop.eup %3148 }
 0x2dd   :  { %v3739_v7 = vpop.eup %3150  ;;  %v1037_v25 = vsel %vm931_vm3, %v3735_v54, 0.0 }
 0x2de   :  { %v1034_v26 = vsel %vm931_vm3, %v3739_v7, 0.0 }
 0x2fa   :  { %1032 = vadd.xlane.f32.xlu0 %v1031_v3 }
 0x2fc   :  { %1029 = vadd.xlane.f32.xlu1 %v1028_v11 }
 0x2fe   :  { %1038 = vadd.xlane.f32.xlu0 %v1037_v25 }
 0x300   :  { %1035 = vadd.xlane.f32.xlu1 %v1034_v26 }
 0x338   :  { %v946_v27 = vpop.xlane.xlu1 %945 }
 0x339   :  { %v984_v28 = vsub.f32 %v3647_v15, %v946_v27 }
 0x33a   :  { %v949_v29 = vpop.xlane.xlu0 %948 }
 0x33b   :  { %v1004_v33 = vmul.f32 1.442695, %v984_v28  ;;  %v985_v34 = vsub.f32 %v3653_v19, %v949_v29 }
 0x33d   :  { %3152 = vpow2.f32 %v1004_v33  ;;  %v1006_v35 = vmul.f32 1.442695, %v985_v34 }
 0x33f   :  { %3154 = vpow2.f32 %v1006_v35 }
 0x340   :  { %v952_v37 = vpop.xlane.xlu1 %951 }
 0x341   :  { %v986_v38 = vsub.f32 %v3659_v24, %v952_v37 }
 0x342   :  { %v955_v39 = vpop.xlane.xlu0 %954 }
 0x343   :  { %v1008_v40 = vmul.f32 1.442695, %v986_v38  ;;  %v987_v42 = vsub.f32 %v3669_v32, %v955_v39 }
 0x344   :  { %v958_v43 = vpop.xlane.xlu1 %957 }
 0x345   :  { %3156 = vpow2.f32 %v1008_v40  ;;  %v1010_v44 = vmul.f32 1.442695, %v987_v42  ;;  %v988_v45 = vsub.f32 %v3665_v30, %v958_v43 }
 0x346   :  { %v961_v15 = vpop.xlane.xlu0 %960 }
 0x347   :  { %v3750_v46 = vpop.eup %3152  ;;  %3158 = vpow2.f32 %v1010_v44  ;;  %v1012_v19 = vmul.f32 1.442695, %v988_v45  ;;  %v989_v49 = vsub.f32 %v3675_v36, %v961_v15 }
 0x348   :  { %v964_v50 = vpop.xlane.xlu1 %963  ;;  %v1040_v24 = vsel %vm931_vm3, %v3750_v46, 0.0 }
 0x349   :  { %v3755_v51 = vpop.eup %3154  ;;  %3160 = vpow2.f32 %v1012_v19  ;;  %v1014_v32 = vmul.f32 1.442695, %v989_v49  ;;  %v990_v55 = vsub.f32 %v3683_v41, %v964_v50  ;;  %1041 = vadd.xlane.f32.xlu1 %v1040_v24  ;;  %v2968_v19 = vunpack.i.h.bf16 %v3721_v62 }
 0x34a   :  { %v967_v59 = vpop.xlane.xlu0 %966  ;;  %v1043_v30 = vsel %vm931_vm3, %v3755_v51, 0.0 }
 0x34b   :  { %3162 = vpow2.f32 %v1014_v32  ;;  %v1016_v61 = vmul.f32 1.442695, %v990_v55  ;;  %v991_v56 = vsub.f32 %v3693_v48, %v967_v59  ;;  %1044 = vadd.xlane.f32.xlu0 %v1043_v30 }
 0x34c   :  { %v970_v36 = vpop.xlane.xlu1 %969 }
 0x34d   :  { %3164 = vpow2.f32 %v1016_v61  ;;  %v1018_v1 = vmul.f32 1.442695, %v991_v56  ;;  %v992_v2 = vsub.f32 %v3689_v47, %v970_v36 }
 0x34e   :  { %v973_v5 = vpop.xlane.xlu0 %972 }
 0x34f   :  { %v3762_v6 = vpop.eup %3156  ;;  %3166 = vpow2.f32 %v1018_v1  ;;  %v1020_v41 = vmul.f32 1.442695, %v992_v2  ;;  %v993_v8 = vsub.f32 %v3699_v52, %v973_v5 }
 0x350   :  { %v976_v63 = vpop.xlane.xlu1 %975  ;;  %v1046_v9 = vsel %vm931_vm3, %v3762_v6, 0.0 }
 0x351   :  { %v3767_v10 = vpop.eup %3158  ;;  %3168 = vpow2.f32 %v1020_v41  ;;  %v1022_v48 = vmul.f32 1.442695, %v993_v8  ;;  %v994_v12 = vsub.f32 %v3707_v57, %v976_v63  ;;  %1047 = vadd.xlane.f32.xlu1 %v1046_v9 }
 0x352   :  { %v979_v13 = vpop.xlane.xlu0 %978  ;;  %v1049_v47 = vsel %vm931_vm3, %v3767_v10, 0.0 }
 0x353   :  { %v3772_v14 = vpop.eup %3160  ;;  %3170 = vpow2.f32 %v1022_v48  ;;  %v1024_v16 = vmul.f32 1.442695, %v994_v12  ;;  %v995_v52 = vsub.f32 %v3713_v4, %v979_v13  ;;  %1050 = vadd.xlane.f32.xlu0 %v1049_v47 }
 0x354   :  { %v1052_v17 = vsel %vm931_vm3, %v3772_v14, 0.0  ;;  %v2976_v37 = vpop.permute.xlu1 %2975 }
 0x355   :  { %v3777_v18 = vpop.eup %3162  ;;  %3172 = vpow2.f32 %v1024_v16  ;;  %v1026_v20 = vmul.f32 1.442695, %v995_v52  ;;  %1053 = vadd.xlane.f32.xlu1 %v1052_v17  ;;  %v2978_v41 = vunpack.i.h.bf16 %v2976_v37  ;;  %v2977_v8 = vunpack.i.l.bf16 %v2976_v37 }
 0x356   :  { %v1055_v57 = vsel %vm931_vm3, %v3777_v18, 0.0  ;;  %v2971_v38 = vpop.permute.xlu0 %2970 }
 0x357   :  { %v3781_v21 = vpop.eup %3164  ;;  %3174 = vpow2.f32 %v1026_v20  ;;  %1056 = vadd.xlane.f32.xlu0 %v1055_v57  ;;  %v2973_v59 = vunpack.i.h.bf16 %v2971_v38  ;;  %v2972_v30 = vunpack.i.l.bf16 %v2971_v38  ;;  %v523_v47 = vpack.c.bf16 %v2978_v41, %v2977_v8 }
 0x358   :  { %v1058_v3 = vsel %vm931_vm3, %v3781_v21, 0.0  ;;  %v3809_v39 = vpop.permute.xlu1 %2980 }
 0x359   :  { %v3785_v4 = vpop.eup %3166  ;;  %1059 = vadd.xlane.f32.xlu1 %v1058_v3  ;;  %v2982_v20 = vunpack.i.l.bf16 %v3809_v39 }
 0x35a   :  { %v1061_v11 = vsel %vm931_vm3, %v3785_v4, 0.0 }
 0x35b   :  { %v3789_v25 = vpop.eup %3168  ;;  %1062 = vadd.xlane.f32.xlu0 %v1061_v11 }
 0x35c   :  { %v1064_v26 = vsel %vm931_vm3, %v3789_v25, 0.0 }
 0x35d   :  { %v3793_v27 = vpop.eup %3170  ;;  %1065 = vadd.xlane.f32.xlu1 %v1064_v26 }
 0x35e   :  { %v1067_v28 = vsel %vm931_vm3, %v3793_v27, 0.0 }
 0x35f   :  { %v3797_v29 = vpop.eup %3172  ;;  %1068 = vadd.xlane.f32.xlu0 %v1067_v28 }
 0x360   :  { %v1070_v33 = vsel %vm931_vm3, %v3797_v29, 0.0 }
 0x361   :  { %v3801_v34 = vpop.eup %3174  ;;  %1071 = vadd.xlane.f32.xlu1 %v1070_v33 }
 0x362   :  { %v1073_v35 = vsel %vm931_vm3, %v3801_v34, 0.0 }
 0x363   :  { %1074 = vadd.xlane.f32.xlu0 %v1073_v35 }
 0x372   :  { %2990 = vrot.lane.b32.xlu1 %v3607_v53, %s3385_s30  ;;  %v2967_v53 = vunpack.i.l.bf16 %v3721_v62 }
 0x374   :  { %v521_v55 = vpack.c.bf16 %v2968_v19, %v2967_v53 }
 0x379   :  { %2985 = vrot.lane.b32.xlu0 %v3563_v60, %s3385_s30 }
 0x387   :  { %v1033_v40 = vpop.xlane.xlu0 %1032 }
 0x388   :  { %3176 = vrcp.f32 %v1033_v40 }
 0x389   :  { %v1030_v42 = vpop.xlane.xlu1 %1029 }
 0x38a   :  { %3178 = vrcp.f32 %v1030_v42 }
 0x38b   :  { %v1039_v43 = vpop.xlane.xlu0 %1038 }
 0x38c   :  { %3180 = vrcp.f32 %v1039_v43 }
 0x38d   :  { %v1036_v44 = vpop.xlane.xlu1 %1035 }
 0x38e   :  { %3182 = vrcp.f32 %v1036_v44 }
 0x392   :  { %v3177_v45 = vpop.eup %3176 }
 0x393   :  { %v1093_v60 = vmul.f32 %v3177_v45, %v3729_v22  ;;  %v522_v22 = vpack.c.bf16 %v2973_v59, %v2972_v30 }
 0x394   :  { %v3179_v15 = vpop.eup %3178 }
 0x395   :  { %v1092_v49 = vmul.f32 %v3179_v15, %v3731_v23 }
 0x396   :  { %v3181_v50 = vpop.eup %3180 }
 0x397   :  { %v1108_v24 = vpack.c.bf16 %v1093_v60, %v1092_v49  ;;  %v1095_v61 = vmul.f32 %v3181_v50, %v3735_v54 }
 0x398   :  { %v3183_v32 = vpop.eup %3182 }
 0x399   :  { %v1094_v56 = vmul.f32 %v3183_v32, %v3739_v7  ;;  %2820 = vmatmul.mubr.msk.bf16.vlgmr.msra.gmra.mrb[16].mxu1 %vm931_vm3, %v1108_v24 }
 0x39a   :  { %2830 = vmatpush3.bf16.msra.mxu1 %v521_v55  ;;  %2831 = vmatprep.mubr.msk.bf16.mxu1 %vm3383_vm0, %v3382_v31 }
 0x39b   :  { %v1109_v62 = vpack.c.bf16 %v1095_v61, %v1094_v56  ;;  %2841 = vmatprep.subr.bf16.mxu1 %v3382_v31 }
 0x39d   :  { %2826 = vmatmul.mubr.msk.bf16.vlgmr.msra.gmra.mrb[28].mxu0 %vm931_vm3, %v1109_v62 }
 0x39e   :  { %2836 = vmatpush3.bf16.msra.mxu0 %v522_v22  ;;  %2837 = vmatprep.mubr.msk.bf16.mxu0 %vm3383_vm0, %v3382_v31 }
 0x39f   :  { %2847 = vmatprep.subr.bf16.mxu0 %v3382_v31 }
 0x3d6   :  { %v1042_v23 = vpop.xlane.xlu1 %1041 }
 0x3d7   :  { %3184 = vrcp.f32 %v1042_v23 }
 0x3d8   :  { %v1045_v54 = vpop.xlane.xlu0 %1044 }
 0x3d9   :  { %3186 = vrcp.f32 %v1045_v54 }
 0x3de   :  { %v1048_v7 = vpop.xlane.xlu1 %1047 }
 0x3df   :  { %3188 = vrcp.f32 %v1048_v7 }
 0x3e0   :  { %v1051_v36 = vpop.xlane.xlu0 %1050 }
 0x3e1   :  { %v3185_v1 = vpop.eup %3184  ;;  %3190 = vrcp.f32 %v1051_v36  ;;  %v3057_v36 = vld [vmem:[#allocation7 + $0x8] sm:$0xff]  }
 0x3e2   :  { %v1054_v2 = vpop.xlane.xlu1 %1053  ;;  %v1096_v63 = vmul.f32 %v3185_v1, %v3750_v46  ;;  %v3058_v1 = vld [vmem:[#allocation7 + $0x10] sm:$0xff]  }
 0x3e3   :  { %v3187_v5 = vpop.eup %3186  ;;  %3192 = vrcp.f32 %v1054_v2 }
 0x3e4   :  { %v1097_v9 = vmul.f32 %v3187_v5, %v3755_v51  ;;  %v1057_v48 = vpop.xlane.xlu0 %1056  ;;  %v2983_v51 = vunpack.i.h.bf16 %v3809_v39  ;;  %v3059_v5 = vld [vmem:[#allocation7 + $0x18] sm:$0xff]  }
 0x3e5   :  { %3194 = vrcp.f32 %v1057_v48  ;;  %v3060_v48 = vld [vmem:[#allocation7 + $0x20] sm:$0xff]  }
 0x3e6   :  { %v1060_v12 = vpop.xlane.xlu1 %1059  ;;  %v1110_v13 = vpack.c.bf16 %v1097_v9, %v1096_v63  ;;  %v524_v37 = vpack.c.bf16 %v2983_v51, %v2982_v20  ;;  %v3062_v51 = vld [vmem:[#allocation7 + $0x30] sm:$0xff]  }
 0x3e7   :  { %3196 = vrcp.f32 %v1060_v12 }
 0x3e8   :  { %2832 = vmatmul.mubr.msk.bf16.vlgmr.msra.gmra.mrb[20].mxu1 %vm931_vm3, %v1110_v13  ;;  %v1063_v16 = vpop.xlane.xlu0 %1062  ;;  %v3061_v13 = vld [vmem:[#allocation7 + $0x28] sm:$0xff]  }
 0x3e9   :  { %v3189_v52 = vpop.eup %3188  ;;  %2842 = vmatpush3.bf16.msra.mxu1 %v523_v47  ;;  %3198 = vrcp.f32 %v1063_v16  ;;  %2843 = vmatprep.mubr.msk.bf16.mxu1 %vm3383_vm0, %v3382_v31 }
 0x3ea   :  { %v1066_v17 = vpop.xlane.xlu1 %1065  ;;  %2853 = vmatprep.subr.bf16.mxu1 %v3382_v31  ;;  %v1098_v57 = vmul.f32 %v3189_v52, %v3762_v6 }
 0x3eb   :  { %v3191_v46 = vpop.eup %3190  ;;  %3200 = vrcp.f32 %v1066_v17 }
 0x3ec   :  { %v1099_v3 = vmul.f32 %v3191_v46, %v3767_v10  ;;  %v1069_v11 = vpop.xlane.xlu0 %1068 }
 0x3ed   :  { %v3193_v26 = vpop.eup %3192  ;;  %3202 = vrcp.f32 %v1069_v11 }
 0x3ee   :  { %v1072_v28 = vpop.xlane.xlu1 %1071  ;;  %v1111_v33 = vpack.c.bf16 %v1099_v3, %v1098_v57  ;;  %v1100_v38 = vmul.f32 %v3193_v26, %v3772_v14 }
 0x3ef   :  { %v3195_v35 = vpop.eup %3194  ;;  %3204 = vrcp.f32 %v1072_v28  ;;  %v3063_v28 = vld [vmem:[#allocation7 + $0x38] sm:$0xff]  }
 0x3f0   :  { %v1101_v40 = vmul.f32 %v3195_v35, %v3777_v18  ;;  %v1075_v42 = vpop.xlane.xlu0 %1074  ;;  %2838 = vmatmul.mubr.msk.bf16.vlgmr.msra.gmra.mrb[32].mxu0 %vm931_vm3, %v1111_v33 }
 0x3f1   :  { %v3197_v39 = vpop.eup %3196  ;;  %3206 = vrcp.f32 %v1075_v42  ;;  %2848 = vmatpush3.bf16.msra.mxu0 %v524_v37  ;;  %2849 = vmatprep.mubr.msk.bf16.mxu0 %vm3383_vm0, %v3382_v31 }
 0x3f2   :  { %v2991_v6 = vpop.permute.xlu1 %2990  ;;  %v1112_v10 = vpack.c.bf16 %v1101_v40, %v1100_v38  ;;  %2859 = vmatprep.subr.bf16.mxu0 %v3382_v31  ;;  %v1102_v14 = vmul.f32 %v3197_v39, %v3781_v21 }
 0x3f3   :  { %v3199_v43 = vpop.eup %3198  ;;  %v2993_v44 = vunpack.i.h.bf16 %v2991_v6  ;;  %v2992_v45 = vunpack.i.l.bf16 %v2991_v6 }
 0x3f4   :  { %v1103_v18 = vmul.f32 %v3199_v43, %v3785_v4  ;;  %2844 = vmatmul.mubr.msk.bf16.vlgmr.msra.gmra.mrb[24].mxu1 %vm931_vm3, %v1112_v10  ;;  %v2986_v15 = vpop.permute.xlu0 %2985 }
 0x3f5   :  { %v3201_v19 = vpop.eup %3200  ;;  %v526_v53 = vpack.c.bf16 %v2993_v44, %v2992_v45  ;;  %v2988_v60 = vunpack.i.h.bf16 %v2986_v15  ;;  %v2987_v49 = vunpack.i.l.bf16 %v2986_v15  ;;  %2855 = vmatprep.mubr.msk.bf16.mxu1 %vm3383_vm0, %v3382_v31 }
 0x3f6   :  { %v1113_v50 = vpack.c.bf16 %v1103_v18, %v1102_v14  ;;  %v1104_v55 = vmul.f32 %v3201_v19, %v3789_v25  ;;  %v3056_v25 = vld [vmem:[#allocation7] sm:$0xff]  }
 0x3f7   :  { %v3203_v24 = vpop.eup %3202  ;;  %v525_v32 = vpack.c.bf16 %v2988_v60, %v2987_v49 }
 0x3f8   :  { %v1105_v59 = vmul.f32 %v3203_v24, %v3793_v27  ;;  %2850 = vmatmul.mubr.msk.bf16.vlgmr.msra.gmra.mrb[36].mxu0 %vm931_vm3, %v1113_v50 }
 0x3f9   :  { %v3205_v21 = vpop.eup %3204  ;;  %2860 = vmatpush3.bf16.msra.mxu0 %v526_v53  ;;  %2854 = vmatpush3.bf16.msra.mxu1 %v525_v32 }
 0x3fa   :  { %v1114_v4 = vpack.c.bf16 %v1105_v59, %v1104_v55  ;;  %2861 = vmatprep.mubr.msk.bf16.mxu0 %vm3383_vm0, %v3382_v31  ;;  %v1106_v61 = vmul.f32 %v3205_v21, %v3797_v29  ;;  %2865 = vmatprep.subr.bf16.mxu1 %v3056_v25 }
 0x3fb   :  { %v3207_v30 = vpop.eup %3206 }
 0x3fc   :  { %v1107_v56 = vmul.f32 %v3207_v30, %v3801_v34  ;;  %2856 = vmatmul.mubr.msk.bf16.vlgmr.msra.gmra.mrb[28].mxu1 %vm931_vm3, %v1114_v4 }
 0x3fd   :  { %2866 = vmatpush3.bf16.msra.mxu1 %v3056_v25 }
 0x3fe   :  { %v1115_v62 = vpack.c.bf16 %v1107_v56, %v1106_v61  ;;  %2867 = vmatprep.subr.bf16.mxu1 %v3057_v36 }
 0x400   :  { %2862 = vmatmul.mubr.msk.bf16.vlgmr.msra.gmra.mrb[40].mxu0 %vm931_vm3, %v1115_v62 }
 0x401   :  { %1971 = vmatprep.mubr.bf16.mxu0 %v3381_v0  ;;  %2868 = vmatpush3.bf16.msra.mxu1 %v3057_v36 }
 0x402   :  { %2869 = vmatprep.subr.bf16.mxu1 %v3058_v1 }
 0x405   :  { %2870 = vmatpush3.bf16.msra.mxu1 %v3058_v1 }
 0x406   :  { %2871 = vmatprep.subr.bf16.mxu1 %v3059_v5 }
 0x409   :  { %2872 = vmatpush3.bf16.msra.mxu1 %v3059_v5 }
 0x40a   :  { %2873 = vmatprep.subr.bf16.mxu1 %v3060_v48 }
 0x40d   :  { %2874 = vmatpush3.bf16.msra.mxu1 %v3060_v48 }
 0x40e   :  { %2875 = vmatprep.subr.bf16.mxu1 %v3061_v13 }
 0x411   :  { %2876 = vmatpush3.bf16.msra.mxu1 %v3061_v13 }
 0x412   :  { %2877 = vmatprep.subr.bf16.mxu1 %v3062_v51 }
 0x415   :  { %2878 = vmatpush3.bf16.msra.mxu1 %v3062_v51 }
 0x416   :  { %2879 = vmatprep.subr.bf16.mxu1 %v3063_v28 }
 0x419   :  { %2880 = vmatpush3.bf16.msra.mxu1 %v3063_v28  ;;  %v3227_v28 = vld [vmem:[#allocation2 + $0x18] sm:$0xff] }
 0x46c   :  { %v3856_v27 = vpop.f32.mrb[16].mxu1 }
 0x46d   :  { %v2821_v22 = vpop.f32.mrb[17].mxu1 }
 0x46e   :  { %v3858_v23 = vpop.f32.mrb[18].mxu1 }
 0x46f   :  { %v2822_v31 = vpop.f32.mrb[19].mxu1 }
 0x470   :  { %v3860_v54 = vpop.f32.mrb[28].mxu0 }
 0x471   :  { %v2827_v29 = vpop.f32.mrb[29].mxu0 }
 0x472   :  { %v3862_v34 = vpop.f32.mrb[30].mxu0 }
 0x473   :  { %v2828_v7 = vpop.f32.mrb[31].mxu0 }
 0x4bb   :  { %v1241_v2 = vpop.f32.mrb[20].mxu1 }
 0x4bc   :  { %v2833_v41 = vpop.f32.mrb[21].mxu1 }
 0x4bd   :  { %v1244_v8 = vpop.f32.mrb[22].mxu1 }
 0x4be   :  { %v2994_v63 = vpack.i.bf16 %v1244_v8, %v1241_v2  ;;  %v2834_v9 = vpop.f32.mrb[23].mxu1 }
 0x4c0   :  { %2995 = vrot.lane.b32.xlu0 %v2994_v63, %s3385_s30 }
 0x4c3   :  { %v1285_v12 = vpop.f32.mrb[32].mxu0 }
 0x4c4   :  { %v2839_v47 = vpop.f32.mrb[33].mxu0 }
 0x4c5   :  { %v1288_v16 = vpop.f32.mrb[34].mxu0 }
 0x4c6   :  { %v2999_v52 = vpack.i.bf16 %v1288_v16, %v1285_v12  ;;  %v2840_v17 = vpop.f32.mrb[35].mxu0 }
 0x4c7   :  { %v1329_v46 = vpop.f32.mrb[24].mxu1 }
 0x4c8   :  { %v2845_v20 = vpop.f32.mrb[25].mxu1  ;;  %3000 = vrot.lane.b32.xlu1 %v2999_v52, %s3385_s30 }
 0x4c9   :  { %v1332_v57 = vpop.f32.mrb[26].mxu1  ;;  %v3225_v20 = vld [vmem:[#allocation2 + $0x8] sm:$0xff] }
 0x4ca   :  { %v3004_v3 = vpack.i.bf16 %v1332_v57, %v1329_v46  ;;  %v2846_v11 = vpop.f32.mrb[27].mxu1  ;;  %v3224_v46 = vld [vmem:[#allocation2] sm:$0xff] }
 0x4cb   :  { %v1373_v26 = vpop.f32.mrb[36].mxu0  ;;  %v3226_v11 = vld [vmem:[#allocation2 + $0x10] sm:$0xff] }
 0x4cc   :  { %3005 = vrot.lane.b32.xlu0 %v3004_v3, %s3378_s0  ;;  %v2851_v33 = vpop.f32.mrb[37].mxu0 }
 0x4cd   :  { %v1376_v35 = vpop.f32.mrb[38].mxu0 }
 0x4ce   :  { %v3009_v37 = vpack.i.bf16 %v1376_v35, %v1373_v26  ;;  %v2852_v38 = vpop.f32.mrb[39].mxu0  ;;  %v3064_v35 = vld [vmem:[#allocation8] ss:$16 sps:$4 sm:$0xff]  }
 0x4cf   :  { %v1417_v40 = vpop.f32.mrb[28].mxu1  ;;  %v3067_v38 = vld [vmem:[#allocation8 + $0x8] ss:$16 sps:$4 sm:$0xff]  }
 0x4d0   :  { %v2857_v42 = vpop.f32.mrb[29].mxu1  ;;  %3010 = vrot.lane.b32.xlu1 %v3009_v37, %s3378_s0  ;;  %v3066_v37 = vld [vmem:[#allocation8 + $0x4] ss:$16 sps:$4 sm:$0xff]  }
 0x4d1   :  { %v1420_v39 = vpop.f32.mrb[30].mxu1  ;;  %v3072_v42 = vld [vmem:[#allocation8 + $0x24] ss:$16 sps:$4 sm:$0xff]   ;;  %1939 = vmatprep.subr.bf16.mxu0 %v3066_v37  ;;  %v2572_v37 = vld [vmem:[%s3973_s8] ss:$0 sm:$0xff] }
 0x4d2   :  { %v3014_v6 = vpack.i.bf16 %v1420_v39, %v1417_v40  ;;  %v2858_v10 = vpop.f32.mrb[31].mxu1  ;;  %v3069_v40 = vld [vmem:[#allocation8 + $0xc] ss:$16 sps:$4 sm:$0xff]   ;;  %1940 = vmatpush1.bf16.msra.mxu0 %v3064_v35 }
 0x4d3   :  { %v1461_v43 = vpop.f32.mrb[40].mxu0  ;;  %v3075_v39 = vld [vmem:[#allocation8 + $0x2c] ss:$16 sps:$4 sm:$0xff]   ;;  %1992 = vmatprep.subr.bf16.mxu1 %v3069_v40  ;;  %1941 = vmatprep.subr.bf16.mxu0 %v3072_v42  ;;  %v3073_v10 = vld [vmem:[#allocation8 + $0x28] ss:$16 sps:$4 sm:$0xff]  }
 0x4d4   :  { %3015 = vrot.lane.b32.xlu0 %v3014_v6, %s3384_s6  ;;  %v2863_v44 = vpop.f32.mrb[41].mxu0  ;;  %v3070_v6 = vld [vmem:[#allocation8 + $0x20] ss:$16 sps:$4 sm:$0xff]  }
 0x4d5   :  { %v1464_v45 = vpop.f32.mrb[42].mxu0 }
 0x4d6   :  { %v3019_v14 = vpack.i.bf16 %v1464_v45, %v1461_v43  ;;  %v2864_v18 = vpop.f32.mrb[43].mxu0  ;;  %1942 = vmatpush1.bf16.msra.mxu0 %v3070_v6 }
 0x4d8   :  { %3020 = vrot.lane.b32.xlu1 %v3019_v14, %s3384_s6 }
 0x532   :  { %v2996_v15 = vpop.permute.xlu0 %2995 }
 0x533   :  { %v2998_v60 = vunpack.i.h.bf16 %v2996_v15  ;;  %v2997_v49 = vunpack.i.l.bf16 %v2996_v15 }
 0x535   :  { %v1517_v55 = vsel %vm534_vm1, %v3858_v23, %v2998_v60  ;;  %v1516_v59 = vsel %vm534_vm1, %v3856_v27, %v2997_v49 }
 0x53a   :  { %v3001_v19 = vpop.permute.xlu1 %3000 }
 0x53b   :  { %v3003_v4 = vunpack.i.h.bf16 %v3001_v19  ;;  %v3002_v30 = vunpack.i.l.bf16 %v3001_v19 }
 0x53d   :  { %v1519_v27 = vsel %vm534_vm1, %v3862_v34, %v3003_v4  ;;  %v1518_v1 = vsel %vm534_vm1, %v3860_v54, %v3002_v30  ;;  %v2563_v34 = vld [vmem:[%s3968_s3] ss:$0 sm:$0xff]  ;;  %v3078_v4 = vld [vmem:[#allocation8 + $0x44] ss:$16 sps:$4 sm:$0xff]   ;;  %v3081_v30 = vld [vmem:[#allocation8 + $0x4c] ss:$16 sps:$4 sm:$0xff]  }
 0x53e   :  { %v3006_v53 = vpop.permute.xlu0 %3005  ;;  %1943 = vmatprep.subr.bf16.mxu0 %v3078_v4  ;;  %v3119_v4 = vld [vmem:[#allocation10 + $0x88] sm:$0xff]  }
 0x53f   :  { %v3008_v50 = vunpack.i.h.bf16 %v3006_v53  ;;  %v3007_v24 = vunpack.i.l.bf16 %v3006_v53 }
 0x541   :  { %v1521_v62 = vsel %vm1520_vm5, %v1516_v59, %v3007_v24  ;;  %v1522_v25 = vsel %vm1520_vm5, %v1517_v55, %v3008_v50 }
 0x542   :  { %v3011_v32 = vpop.permute.xlu1 %3010 }
 0x543   :  { %v3013_v22 = vunpack.i.h.bf16 %v3011_v32  ;;  %v3012_v31 = vunpack.i.l.bf16 %v3011_v32 }
 0x545   :  { %v1524_v41 = vsel %vm1520_vm5, %v1519_v27, %v3013_v22  ;;  %v1523_v8 = vsel %vm1520_vm5, %v1518_v1, %v3012_v31  ;;  %v3082_v22 = vld [vmem:[#allocation8 + $0x60] ss:$16 sps:$4 sm:$0xff]   ;;  %v3085_v31 = vld [vmem:[#allocation8 + $0x68] ss:$16 sps:$4 sm:$0xff]   ;;  %v3096_v27 = vld [vmem:[#allocation8 + $0xa4] ss:$16 sps:$4 sm:$0xff]  }
 0x546   :  { %v3016_v21 = vpop.permute.xlu0 %3015  ;;  %v3099_v1 = vld [vmem:[#allocation8 + $0xac] ss:$16 sps:$4 sm:$0xff]  }
 0x547   :  { %v3018_v61 = vunpack.i.h.bf16 %v3016_v21  ;;  %v3017_v56 = vunpack.i.l.bf16 %v3016_v21 }
 0x549   :  { %v1526_v29 = vsel %vm1525_vm6, %v1521_v62, %v3017_v56  ;;  %v1527_v7 = vsel %vm1525_vm6, %v1522_v25, %v3018_v61  ;;  %v3076_v61 = vld [vmem:[#allocation8 + $0x40] ss:$16 sps:$4 sm:$0xff]   ;;  %v3079_v56 = vld [vmem:[#allocation8 + $0x48] ss:$16 sps:$4 sm:$0xff]   ;;  %v3084_v62 = vld [vmem:[#allocation8 + $0x64] ss:$16 sps:$4 sm:$0xff]  }
 0x54a   :  { %v3021_v23 = vpop.permute.xlu1 %3020  ;;  %v1530_v36 = vpack.c.bf16 %v1527_v7, %v1526_v29  ;;  %1944 = vmatpush1.bf16.msra.mxu0 %v3076_v61  ;;  %v3087_v25 = vld [vmem:[#allocation8 + $0x6c] ss:$16 sps:$4 sm:$0xff]   ;;  %v3090_v29 = vld [vmem:[#allocation8 + $0x84] ss:$16 sps:$4 sm:$0xff]  }
 0x54b   :  { %v3023_v2 = vunpack.i.h.bf16 %v3021_v23  ;;  %v3022_v5 = vunpack.i.l.bf16 %v3021_v23  ;;  %1945 = vmatprep.subr.bf16.mxu0 %v3084_v62  ;;  %v3093_v7 = vld [vmem:[#allocation8 + $0x8c] ss:$16 sps:$4 sm:$0xff]   ;;  %v3088_v23 = vld [vmem:[#allocation8 + $0x80] ss:$16 sps:$4 sm:$0xff]  }
 0x54c   :  { %2881 = vmatprep.mubr.bf16.mxu1 %v1530_v36  ;;  %v3091_v36 = vld [vmem:[#allocation8 + $0x88] ss:$16 sps:$4 sm:$0xff]   ;;  %v3122_v62 = vld [vmem:[#allocation10 + $0x10] sm:$0xff]  }
 0x54d   :  { %v1529_v63 = vsel %vm1525_vm6, %v1524_v41, %v3023_v2  ;;  %v1528_v9 = vsel %vm1525_vm6, %v1523_v8, %v3022_v5  ;;  %v3094_v2 = vld [vmem:[#allocation8 + $0xa0] ss:$16 sps:$4 sm:$0xff]   ;;  %v3097_v5 = vld [vmem:[#allocation8 + $0xa8] ss:$16 sps:$4 sm:$0xff]   ;;  %v3102_v41 = vld [vmem:[#allocation8 + $0xc4] ss:$16 sps:$4 sm:$0xff]  }
 0x54e   :  { %v1531_v48 = vpack.c.bf16 %v1529_v63, %v1528_v9  ;;  %1946 = vmatpush1.bf16.msra.mxu0 %v3082_v22  ;;  %v3105_v8 = vld [vmem:[#allocation8 + $0xcc] ss:$16 sps:$4 sm:$0xff]   ;;  %v3100_v63 = vld [vmem:[#allocation8 + $0xc0] ss:$16 sps:$4 sm:$0xff]   ;;  %v3103_v9 = vld [vmem:[#allocation8 + $0xc8] ss:$16 sps:$4 sm:$0xff]  }
 0x54f   :  { %1947 = vmatprep.subr.bf16.mxu0 %v3090_v29  ;;  %v3125_v22 = vld [vmem:[#allocation10 + $0xd8] sm:$0xff]  }
 0x550   :  { %2882 = vmatmul.mubr.bf16.vlgmr.msra.gmra.mrb[32].mxu1 %v1531_v48  ;;  %v3108_v48 = vld [vmem:[#allocation8 + $0xe4] ss:$16 sps:$4 sm:$0xff]   ;;  %v3127_v29 = vld [vmem:[#allocation10 + $0x98] sm:$0xff]  }
 0x551   :  { %2024 = vmatprep.mubr.bf16.mxu1 %v3381_v0  ;;  %1993 = vmatpush1.bf16.msra.mxu1 %v3067_v38 }
 0x552   :  { %1994 = vmatprep.subr.bf16.mxu1 %v3075_v39  ;;  %1948 = vmatpush1.bf16.msra.mxu0 %v3088_v23  ;;  %v3129_v23 = vld [vmem:[#allocation10 + $0xe0] sm:$0xff]  }
 0x553   :  { %1949 = vmatprep.subr.bf16.mxu0 %v3096_v27  ;;  %v3131_v27 = vld [vmem:[#allocation10 + $0xa0] sm:$0xff]  }
 0x555   :  { %1995 = vmatpush1.bf16.msra.mxu1 %v3073_v10  ;;  %v2573_v10 = vld [vmem:[%s3974_s9] ss:$0 sm:$0xff] }
 0x556   :  { %1996 = vmatprep.subr.bf16.mxu1 %v3081_v30  ;;  %1950 = vmatpush1.bf16.msra.mxu0 %v3094_v2  ;;  %v3121_v30 = vld [vmem:[#allocation10 + $0xd0] sm:$0xff]   ;;  %v3133_v2 = vld [vmem:[#allocation10 + $0xe8] sm:$0xff]  }
 0x557   :  { %1951 = vmatprep.subr.bf16.mxu0 %v3102_v41  ;;  %v3135_v41 = vld [vmem:[#allocation10 + $0xa8] sm:$0xff]  }
 0x559   :  { %1997 = vmatpush1.bf16.msra.mxu1 %v3079_v56 }
 0x55a   :  { %1998 = vmatprep.subr.bf16.mxu1 %v3087_v25  ;;  %1952 = vmatpush1.bf16.msra.mxu0 %v3100_v63  ;;  %v3123_v25 = vld [vmem:[#allocation10 + $0x90] sm:$0xff]  }
 0x55b   :  { %1953 = vmatprep.subr.bf16.mxu0 %v3108_v48  ;;  %v3137_v63 = vld [vmem:[#allocation10 + $0xf0] sm:$0xff]  }
 0x55c   :  { %v3139_v48 = vld [vmem:[#allocation10 + $0xb0] sm:$0xff]  }
 0x55d   :  { %1999 = vmatpush1.bf16.msra.mxu1 %v3085_v31  ;;  %v3126_v31 = vld [vmem:[#allocation10 + $0x18] sm:$0xff]  }
 0x55e   :  { %2000 = vmatprep.subr.bf16.mxu1 %v3093_v7  ;;  %v3128_v7 = vld [vmem:[#allocation10 + $0x60] sm:$0xff]  }
 0x561   :  { %2001 = vmatpush1.bf16.msra.mxu1 %v3091_v36  ;;  %v3130_v36 = vld [vmem:[#allocation10 + $0x20] sm:$0xff]  }
 0x562   :  { %2002 = vmatprep.subr.bf16.mxu1 %v3099_v1  ;;  %v3132_v1 = vld [vmem:[#allocation10 + $0x68] sm:$0xff]  }
 0x565   :  { %2003 = vmatpush1.bf16.msra.mxu1 %v3097_v5  ;;  %v3134_v5 = vld [vmem:[#allocation10 + $0x28] sm:$0xff]  }
 0x566   :  { %2004 = vmatprep.subr.bf16.mxu1 %v3105_v8  ;;  %v3136_v8 = vld [vmem:[#allocation10 + $0x70] sm:$0xff]  }
 0x569   :  { %2005 = vmatpush1.bf16.msra.mxu1 %v3103_v9  ;;  %v3138_v9 = vld [vmem:[#allocation10 + $0x30] sm:$0xff]  }
 0x623   :  { %v2883_v54 = vpop.f32.mrb[32].mxu1 }
 0x624   :  { %v1637_v12 = vpop.f32.mrb[33].mxu1  ;;  %v1646_v52 = vadd.f32 %v2883_v54, %v2563_v34  ;;  %v3106_v54 = vld [vmem:[#allocation8 + $0xe0] ss:$16 sps:$4 sm:$0xff]  }
 0x625   :  { %v1638_v13 = vadd.f32 %v2563_v34, %v1637_v12  ;;  %v2884_v47 = vpop.f32.mrb[34].mxu1  ;;  %v3109_v12 = vld [vmem:[#allocation8 + $0xe8] ss:$16 sps:$4 sm:$0xff]   ;;  %1954 = vmatpush1.bf16.msra.mxu0 %v3106_v54 }
 0x626   :  { %v1640_v16 = vpop.f32.mrb[35].mxu1  ;;  %v1649_v3 = vadd.f32 %v2884_v47, %v2563_v34  ;;  %v1654_v26 = vadd.f32 %v3226_v11, %v1646_v52  ;;  %v3113_v47 = vld [vmem:[#allocation10 + $0xc0] sm:$0xff]   ;;  %v3141_v54 = vld [vmem:[#allocation10 + $0xf8] sm:$0xff]  }
 0x627   :  { %v1641_v17 = vadd.f32 %v2563_v34, %v1640_v16  ;;  %v1652_v51 = vadd.f32 %v3224_v46, %v1638_v13  ;;  %v3111_v34 = vld [vmem:[#allocation8 + $0xec] ss:$16 sps:$4 sm:$0xff]   ;;  %v3112_v13 = vld [vmem:[#allocation10 + $0x40] sm:$0xff]  }
 0x628   :  { %v1655_v33 = vadd.f32 %v3227_v28, %v1649_v3  ;;  %2006 = vmatprep.subr.bf16.mxu1 %v3111_v34  ;;  %2693 = vmatprep.subr.bf16.mxu0 %v3112_v13  ;;  %v3140_v34 = vld [vmem:[#allocation10 + $0x78] sm:$0xff]  }
 0x629   :  { %1658 = vadd.xlane.f32.xlu0 %v1652_v51  ;;  %v1653_v57 = vadd.f32 %v3225_v20, %v1641_v17  ;;  %2007 = vmatpush1.bf16.msra.mxu1 %v3109_v12  ;;  %v3142_v12 = vld [vmem:[#allocation10 + $0x38] sm:$0xff]  }
 0x62a   :  { %2721 = vmatprep.subr.bf16.mxu1 %v3113_v47  ;;  %v3143_v13 = vld [vmem:[#allocation10 + $0xb8] sm:$0xff]   ;;  %v1761_v47 = vsub.s32 0, %v3609_v58 }
 0x62b   :  { %1660 = vadd.xlane.f32.xlu1 %v1653_v57 }
 0x62d   :  { %1662 = vadd.xlane.f32.xlu0 %v1654_v26 }
 0x631   :  { %1664 = vadd.xlane.f32.xlu0 %v1655_v33 }
 0x6b6   :  { %v1659_v43 = vpop.xlane.xlu0 %1658 }
 0x6b7   :  { %v1667_v44 = vmul.f32 0.0078125, %v1659_v43 }
 0x6b8   :  { %v1661_v45 = vpop.xlane.xlu1 %1660 }
 0x6b9   :  { %v3890_v14 = vsub.f32 %v1652_v51, %v1667_v44  ;;  %v1668_v18 = vmul.f32 0.0078125, %v1661_v45 }
 0x6ba   :  { %v1663_v15 = vpop.xlane.xlu0 %1662 }
 0x6bb   :  { %v3892_v19 = vsub.f32 %v1653_v57, %v1668_v18  ;;  %v1669_v53 = vmul.f32 0.0078125, %v1663_v15  ;;  %v1675_v60 = vmul.f32 %v3890_v14, %v3890_v14 }
 0x6bd   :  { %v3896_v49 = vsub.f32 %v1654_v26, %v1669_v53  ;;  %1679 = vadd.xlane.f32.xlu1 %v1675_v60  ;;  %v1676_v50 = vmul.f32 %v3892_v19, %v3892_v19  ;;  %v3115_v60 = vld [vmem:[#allocation10 + $0x80] sm:$0xff]  }
 0x6be   :  { %v1665_v24 = vpop.xlane.xlu0 %1664 }
 0x6bf   :  { %v1670_v32 = vmul.f32 0.0078125, %v1665_v24  ;;  %1681 = vadd.xlane.f32.xlu0 %v1676_v50  ;;  %v1677_v55 = vmul.f32 %v3896_v49, %v3896_v49  ;;  %v3116_v50 = vld [vmem:[#allocation10 + $0x48] sm:$0xff]  }
 0x6c0   :  { %v3117_v24 = vld [vmem:[#allocation10 + $0xc8] sm:$0xff]  }
 0x6c1   :  { %v3902_v59 = vsub.f32 %v1655_v33, %v1670_v32  ;;  %1683 = vadd.xlane.f32.xlu1 %v1677_v55 }
 0x6c3   :  { %v1678_v21 = vmul.f32 %v3902_v59, %v3902_v59 }
 0x6c5   :  { %1685 = vadd.xlane.f32.xlu0 %v1678_v21 }
 0x74a   :  { %v1680_v16 = vpop.xlane.xlu1 %1679 }
 0x74b   :  { %v1687_v52 = vmul.f32 0.0078125, %v1680_v16  ;;  %v1769_v16 = vsub.s32 2, %v3609_v58 }
 0x74c   :  { %v1682_v17 = vpop.xlane.xlu0 %1681 }
 0x74d   :  { %v1691_v46 = vadd.f32 1e-05, %v1687_v52  ;;  %v1688_v51 = vmul.f32 0.0078125, %v1682_v17  ;;  %v1757_v52 = vld [vmem:[%s3970_s5] sm:$0xf]  ;;  %v1765_v17 = vsub.s32 1, %v3609_v58 }
 0x74e   :  { %v1684_v20 = vpop.xlane.xlu1 %1683 }
 0x74f   :  { %3208 = vrsqrt.f32 %v1691_v46  ;;  %v1692_v57 = vadd.f32 1e-05, %v1688_v51  ;;  %v1689_v3 = vmul.f32 0.0078125, %v1684_v20  ;;  %v1773_v46 = vsub.s32 3, %v3609_v58 }
 0x750   :  { %v1762_v51 = vrot.slane %v1757_v52, %v1761_v47  ;;  %v1770_v20 = vrot.slane %v1757_v52, %v1769_v16 }
 0x751   :  { %3210 = vrsqrt.f32 %v1692_v57  ;;  %v1693_v11 = vadd.f32 1e-05, %v1689_v3  ;;  %v1766_v57 = vrot.slane %v1757_v52, %v1765_v17  ;;  %v1774_v3 = vrot.slane %v1757_v52, %v1773_v46 }
 0x752   :  { %v1686_v26 = vpop.xlane.xlu0 %1685 }
 0x753   :  { %3212 = vrsqrt.f32 %v1693_v11  ;;  %v1690_v28 = vmul.f32 0.0078125, %v1686_v26 }
 0x755   :  { %v1694_v33 = vadd.f32 1e-05, %v1690_v28 }
 0x757   :  { %3214 = vrsqrt.f32 %v1694_v33 }
 0x759   :  { %v3209_v35 = vpop.eup %3208 }
 0x75a   :  { %v1699_v38 = vmul.f32 %v3209_v35, %v3890_v14 }
 0x75b   :  { %v3211_v40 = vpop.eup %3210 }
 0x75c   :  { %v1700_v42 = vmul.f32 %v3211_v40, %v3892_v19  ;;  %v1709_v39 = vmul.f32 %v2572_v37, %v1699_v38  ;;  %v3114_v19 = vld [vmem:[#allocation10] sm:$0xff]  }
 0x75d   :  { %v3213_v6 = vpop.eup %3212 }
 0x75e   :  { %v1710_v43 = vmul.f32 %v2572_v37, %v1700_v42  ;;  %v3914_v44 = vadd.f32 %v2573_v10, %v1709_v39  ;;  %v1701_v18 = vmul.f32 %v3213_v6, %v3896_v49  ;;  %v3118_v49 = vld [vmem:[#allocation10 + $0x8] sm:$0xff]  }
 0x760   :  { %v3916_v45 = vadd.f32 %v2573_v10, %v1710_v43  ;;  %v1711_v32 = vmul.f32 %v2572_v37, %v1701_v18 }
 0x761   :  { %v3215_v15 = vpop.eup %3214 }
 0x762   :  { %v1723_v14 = vpack.c.bf16 %v3916_v45, %v3914_v44  ;;  %v1702_v53 = vmul.f32 %v3215_v15, %v3902_v59  ;;  %v3120_v59 = vld [vmem:[#allocation10 + $0x50] sm:$0xff]   ;;  %v3926_v61 = vadd.f32 %v2573_v10, %v1711_v32 }
 0x764   :  { %1972 = vmatmul.mubr.bf16.vlgmr.msra.gmra.mrb[44].mxu0 %v1723_v14  ;;  %2025 = vmatmul.mubr.bf16.vlgmr.msra.gmra.mrb[36].mxu1 %v1723_v14  ;;  %v1712_v55 = vmul.f32 %v2572_v37, %v1702_v53 }
 0x765   :  { %1981 = vmatprep.mubr.bf16.mxu0 %v3381_v0  ;;  %2034 = vmatprep.mubr.bf16.mxu1 %v3381_v0  ;;  %v3124_v0 = vld [vmem:[#allocation10 + $0x58] sm:$0xff]  }
 0x766   :  { %v3924_v21 = vadd.f32 %v2573_v10, %v1712_v55  ;;  %2694 = vmatpush3.bf16.msra.mxu0 %v3114_v19  ;;  %2722 = vmatpush3.bf16.msra.mxu1 %v3115_v60 }
 0x767   :  { %2695 = vmatprep.subr.bf16.mxu0 %v3116_v50  ;;  %2723 = vmatprep.subr.bf16.mxu1 %v3117_v24 }
 0x768   :  { %v1724_v56 = vpack.c.bf16 %v3924_v21, %v3926_v61 }
 0x76a   :  { %2696 = vmatpush3.bf16.msra.mxu0 %v3118_v49  ;;  %2724 = vmatpush3.bf16.msra.mxu1 %v3119_v4 }
 0x76b   :  { %2697 = vmatprep.subr.bf16.mxu0 %v3120_v59  ;;  %2725 = vmatprep.subr.bf16.mxu1 %v3121_v30 }
 0x76c   :  { %1982 = vmatmul.mubr.bf16.gmra.mrb[48].mxu0 %v1724_v56  ;;  %2035 = vmatmul.mubr.bf16.gmra.mrb[40].mxu1 %v1724_v56 }
 0x76e   :  { %2698 = vmatpush3.bf16.msra.mxu0 %v3122_v62  ;;  %2726 = vmatpush3.bf16.msra.mxu1 %v3123_v25 }
 0x76f   :  { %2699 = vmatprep.subr.bf16.mxu0 %v3124_v0  ;;  %2727 = vmatprep.subr.bf16.mxu1 %v3125_v22 }
 0x772   :  { %2700 = vmatpush3.bf16.msra.mxu0 %v3126_v31  ;;  %2728 = vmatpush3.bf16.msra.mxu1 %v3127_v29 }
 0x773   :  { %2701 = vmatprep.subr.bf16.mxu0 %v3128_v7  ;;  %2729 = vmatprep.subr.bf16.mxu1 %v3129_v23 }
 0x776   :  { %2702 = vmatpush3.bf16.msra.mxu0 %v3130_v36  ;;  %2730 = vmatpush3.bf16.msra.mxu1 %v3131_v27 }
 0x777   :  { %2703 = vmatprep.subr.bf16.mxu0 %v3132_v1  ;;  %2731 = vmatprep.subr.bf16.mxu1 %v3133_v2 }
 0x77a   :  { %2704 = vmatpush3.bf16.msra.mxu0 %v3134_v5  ;;  %2732 = vmatpush3.bf16.msra.mxu1 %v3135_v41 }
 0x77b   :  { %2705 = vmatprep.subr.bf16.mxu0 %v3136_v8  ;;  %2733 = vmatprep.subr.bf16.mxu1 %v3137_v63 }
 0x77e   :  { %2706 = vmatpush3.bf16.msra.mxu0 %v3138_v9  ;;  %2734 = vmatpush3.bf16.msra.mxu1 %v3139_v48 }
 0x77f   :  { %2707 = vmatprep.subr.bf16.mxu0 %v3140_v34  ;;  %2735 = vmatprep.subr.bf16.mxu1 %v3141_v54 }
 0x782   :  { %2708 = vmatpush3.bf16.msra.mxu0 %v3142_v12  ;;  %2736 = vmatpush3.bf16.msra.mxu1 %v3143_v13 }
 0x837   :  { %v1973_v11 = vpop.f32.mrb[44].mxu0  ;;  %v2026_v26 = vpop.f32.mrb[36].mxu1 }
 0x838   :  { %v1974_v28 = vadd.f32 %v1973_v11, %v1762_v51  ;;  %v2027_v33 = vadd.f32 %v2026_v26, %v1770_v20  ;;  %v1975_v35 = vpop.f32.mrb[45].mxu0  ;;  %v2028_v37 = vpop.f32.mrb[37].mxu1 }
 0x839   :  { %v1976_v38 = vadd.f32 %v1975_v35, %v1766_v57  ;;  %v2029_v40 = vadd.f32 %v2028_v37, %v1774_v3  ;;  %v1977_v42 = vpop.f32.mrb[46].mxu0  ;;  %v2030_v39 = vpop.f32.mrb[38].mxu1 }
 0x83a   :  { %v1978_v6 = vadd.f32 %v1977_v42, %v1762_v51  ;;  %v2031_v10 = vadd.f32 %v2030_v39, %v1770_v20  ;;  %v1979_v43 = vpop.f32.mrb[47].mxu0  ;;  %v2032_v18 = vpop.f32.mrb[39].mxu1  ;;  %v2045_v14 = vmax.f32 %v1974_v28, 0.0  ;;  %v2047_v53 = vmax.f32 %v2027_v33, 0.0 }
 0x83b   :  { %v1980_v15 = vadd.f32 %v1979_v43, %v1766_v57  ;;  %v2033_v58 = vadd.f32 %v2032_v18, %v1774_v3  ;;  %v2046_v50 = vmax.f32 %v1976_v38, 0.0  ;;  %v2048_v24 = vmax.f32 %v2029_v40, 0.0 }
 0x83c   :  { %v2049_v19 = vmax.f32 %v1978_v6, 0.0  ;;  %v2051_v60 = vmax.f32 %v2031_v10, 0.0 }
 0x83d   :  { %v2050_v32 = vmax.f32 %v1980_v15, 0.0  ;;  %v2052_v55 = vmax.f32 %v2033_v58, 0.0 }
 0x83e   :  { %v2061_v49 = vpack.c.bf16 %v2049_v19, %v2045_v14  ;;  %v2063_v4 = vpack.c.bf16 %v2051_v60, %v2047_v53 }
 0x83f   :  { %v2062_v59 = vpack.c.bf16 %v2050_v32, %v2046_v50  ;;  %v2064_v30 = vpack.c.bf16 %v2052_v55, %v2048_v24  ;;  %v1983_v56 = vpop.f32.mrb[48].mxu0  ;;  %v2036_v62 = vpop.f32.mrb[40].mxu1 }
 0x840   :  { %v1984_v25 = vadd.f32 %v1983_v56, %v1762_v51  ;;  %v2037_v0 = vadd.f32 %v2036_v62, %v1770_v20  ;;  %v1985_v22 = vpop.f32.mrb[49].mxu0  ;;  %v2038_v31 = vpop.f32.mrb[41].mxu1 }
 0x841   :  { %v1986_v29 = vadd.f32 %v1985_v22, %v1766_v57  ;;  %v2039_v7 = vadd.f32 %v2038_v31, %v1774_v3  ;;  %v1987_v23 = vpop.f32.mrb[50].mxu0  ;;  %v2040_v36 = vpop.f32.mrb[42].mxu1  ;;  %2364 = vmatprep.mubr.bf16.mxu0 %v2062_v59  ;;  %2413 = vmatprep.mubr.bf16.mxu1 %v2064_v30 }
 0x842   :  { %v1988_v27 = vadd.f32 %v1987_v23, %v1762_v51  ;;  %v2041_v1 = vadd.f32 %v2040_v36, %v1770_v20  ;;  %v1989_v2 = vpop.f32.mrb[51].mxu0  ;;  %v2042_v5 = vpop.f32.mrb[43].mxu1  ;;  %2365 = vmatmul.mubr.bf16.vlgmr.msra.gmra.mrb[52].mxu0 %v2061_v49  ;;  %2414 = vmatmul.mubr.bf16.vlgmr.msra.gmra.mrb[44].mxu1 %v2063_v4  ;;  %v2053_v63 = vmax.f32 %v1984_v25, 0.0  ;;  %v2055_v9 = vmax.f32 %v2037_v0, 0.0 }
 0x843   :  { %v1990_v41 = vadd.f32 %v1989_v2, %v1766_v57  ;;  %v2043_v8 = vadd.f32 %v2042_v5, %v1774_v3  ;;  %v2054_v54 = vmax.f32 %v1986_v29, 0.0  ;;  %v2056_v12 = vmax.f32 %v2039_v7, 0.0  ;;  %v2606_v57 = vld [vmem:[%s3972_s7] ss:$0 sm:$0xff] }
 0x844   :  { %v2057_v48 = vmax.f32 %v1988_v27, 0.0  ;;  %v2059_v34 = vmax.f32 %v2041_v1, 0.0 }
 0x845   :  { %v2058_v13 = vmax.f32 %v1990_v41, 0.0  ;;  %v2060_v47 = vmax.f32 %v2043_v8, 0.0 }
 0x846   :  { %v2065_v16 = vpack.c.bf16 %v2057_v48, %v2053_v63  ;;  %v2067_v52 = vpack.c.bf16 %v2059_v34, %v2055_v9 }
 0x847   :  { %v2066_v17 = vpack.c.bf16 %v2058_v13, %v2054_v54  ;;  %v2068_v46 = vpack.c.bf16 %v2060_v47, %v2056_v12 }
 0x849   :  { %2372 = vmatprep.mubr.bf16.mxu0 %v2066_v17  ;;  %2421 = vmatprep.mubr.bf16.mxu1 %v2068_v46 }
 0x84a   :  { %2373 = vmatmul.mubr.bf16.gmra.mrb[56].mxu0 %v2065_v16  ;;  %2422 = vmatmul.mubr.bf16.gmra.mrb[48].mxu1 %v2067_v52 }
 0x915   :  { %v2709_v51 = vpop.f32.mrb[52].mxu0  ;;  %v2737_v20 = vpop.f32.mrb[44].mxu1 }
 0x916   :  { %v2710_v3 = vpop.f32.mrb[53].mxu0  ;;  %v2738_v11 = vpop.f32.mrb[45].mxu1 }
 0x917   :  { %v2711_v26 = vadd.f32 %v2710_v3, %v2709_v51  ;;  %v2739_v28 = vadd.f32 %v2738_v11, %v2737_v20  ;;  %v2712_v33 = vpop.f32.mrb[54].mxu0  ;;  %v2740_v35 = vpop.f32.mrb[46].mxu1 }
 0x918   :  { %v2713_v37 = vpop.f32.mrb[55].mxu0  ;;  %v2741_v38 = vpop.f32.mrb[47].mxu1 }
 0x919   :  { %v2367_v40 = vadd.f32 %v2711_v26, %v2606_v57  ;;  %v2714_v42 = vadd.f32 %v2713_v37, %v2712_v33  ;;  %v2742_v39 = vadd.f32 %v2741_v38, %v2740_v35  ;;  %v2640_v26 = vld [vmem:[%s3976_s11] ss:$0 sm:$0xff] }
 0x91b   :  { %v2416_v6 = vadd.f32 %v2739_v28, %v2367_v40  ;;  %v2370_v10 = vadd.f32 %v2714_v42, %v2606_v57 }
 0x91d   :  { %v2419_v43 = vadd.f32 %v2742_v39, %v2370_v10  ;;  %v2715_v18 = vpop.f32.mrb[56].mxu0  ;;  %v2743_v15 = vpop.f32.mrb[48].mxu1  ;;  %v2430_v58 = vadd.f32 %v2416_v6, %v3914_v44 }
 0x91e   :  { %v2716_v14 = vpop.f32.mrb[57].mxu0  ;;  %v2744_v53 = vpop.f32.mrb[49].mxu1 }
 0x91f   :  { %v2717_v19 = vadd.f32 %v2716_v14, %v2715_v18  ;;  %v2745_v60 = vadd.f32 %v2744_v53, %v2743_v15  ;;  %v2718_v50 = vpop.f32.mrb[58].mxu0  ;;  %v2746_v24 = vpop.f32.mrb[50].mxu1  ;;  %2436 = vadd.xlane.f32.xlu1 %v2430_v58  ;;  %v2431_v32 = vadd.f32 %v2419_v43, %v3916_v45 }
 0x920   :  { %v2719_v55 = vpop.f32.mrb[59].mxu0  ;;  %v2747_v49 = vpop.f32.mrb[51].mxu1 }
 0x921   :  { %v2375_v4 = vadd.f32 %v2717_v19, %v2606_v57  ;;  %v2720_v59 = vadd.f32 %v2719_v55, %v2718_v50  ;;  %v2748_v30 = vadd.f32 %v2747_v49, %v2746_v24  ;;  %2438 = vadd.xlane.f32.xlu0 %v2431_v32 }
 0x923   :  { %v2424_v56 = vadd.f32 %v2745_v60, %v2375_v4  ;;  %v2378_v62 = vadd.f32 %v2720_v59, %v2606_v57  ;;  %v2639_v57 = vld [vmem:[%s3975_s10] ss:$0 sm:$0xff]  ;;  %s2509_s10 = sshll.u32 %s3386_s23, 4  ;;  %s2510_s10 = int_to_ptr.vmem [resolvable:$true] %s2509_s10 }
 0x924   :  { %s3338_s11 = scalar_lea.vmem %s2510_s10, 512  ;;  %p3343_p13 = scmp.lt.s32.totalorder %s2510_s10, %s2510_s10 }
 0x925   :  { %v2427_v25 = vadd.f32 %v2748_v30, %v2378_v62  ;;  %v2432_v44 = vadd.f32 %v2424_v56, %v3926_v61  ;;  %p3339_p12 = scmp.ne.s32.totalorder %s2510_s10, %s3338_s11  ;;  %p3344_p0 = scmp.lt.s32.totalorder %s3338_s11, %s3338_s11 }
 0x927   :  { %2440 = vadd.xlane.f32.xlu1 %v2432_v44  ;;  %v2433_v0 = vadd.f32 %v2427_v25, %v3924_v21  ;;  %p3345_p1 = por %p3344_p0, %p3343_p13 }
 0x929   :  { %2442 = vadd.xlane.f32.xlu0 %v2433_v0  ;;  %p3346_p2 = pnand %p3345_p1, %p3339_p12 }
 0x9ac   :  { %v2437_v22 = vpop.xlane.xlu1 %2436 }
 0x9ad   :  { %v2444_v31 = vmul.f32 0.0078125, %v2437_v22 }
 0x9ae   :  { %v2439_v29 = vpop.xlane.xlu0 %2438 }
 0x9af   :  { %v2448_v7 = vsub.f32 %v2430_v58, %v2444_v31  ;;  %v2445_v45 = vmul.f32 0.0078125, %v2439_v29 }
 0x9b1   :  { %v2449_v23 = vsub.f32 %v2431_v32, %v2445_v45  ;;  %v2452_v36 = vmul.f32 %v2448_v7, %v2448_v7 }
 0x9b3   :  { %2456 = vadd.xlane.f32.xlu1 %v2452_v36  ;;  %v2453_v27 = vmul.f32 %v2449_v23, %v2449_v23 }
 0x9b4   :  { %v2441_v1 = vpop.xlane.xlu1 %2440 }
 0x9b5   :  { %v2446_v2 = vmul.f32 0.0078125, %v2441_v1  ;;  %2458 = vadd.xlane.f32.xlu0 %v2453_v27 }
 0x9b6   :  { %v2443_v5 = vpop.xlane.xlu0 %2442 }
 0x9b7   :  { %v2450_v41 = vsub.f32 %v2432_v44, %v2446_v2  ;;  %v2447_v8 = vmul.f32 0.0078125, %v2443_v5 }
 0x9b9   :  { %v2451_v61 = vsub.f32 %v2433_v0, %v2447_v8  ;;  %v2454_v63 = vmul.f32 %v2450_v41, %v2450_v41 }
 0x9bb   :  { %2460 = vadd.xlane.f32.xlu1 %v2454_v63  ;;  %v2455_v21 = vmul.f32 %v2451_v61, %v2451_v61 }
 0x9bd   :  { %2462 = vadd.xlane.f32.xlu0 %v2455_v21 }
 0xa40   :  { %v2457_v9 = vpop.xlane.xlu1 %2456 }
 0xa41   :  { %v2464_v48 = vmul.f32 0.0078125, %v2457_v9 }
 0xa42   :  { %v2459_v34 = vpop.xlane.xlu0 %2458 }
 0xa43   :  { %v2468_v54 = vadd.f32 1e-05, %v2464_v48  ;;  %v2465_v12 = vmul.f32 0.0078125, %v2459_v34 }
 0xa45   :  { %3216 = vrsqrt.f32 %v2468_v54  ;;  %v2469_v13 = vadd.f32 1e-05, %v2465_v12 }
 0xa47   :  { %3218 = vrsqrt.f32 %v2469_v13 }
 0xa48   :  { %v2461_v47 = vpop.xlane.xlu1 %2460 }
 0xa49   :  { %v2466_v16 = vmul.f32 0.0078125, %v2461_v47 }
 0xa4a   :  { %v2463_v52 = vpop.xlane.xlu0 %2462 }
 0xa4b   :  { %v2470_v17 = vadd.f32 1e-05, %v2466_v16  ;;  %v2467_v46 = vmul.f32 0.0078125, %v2463_v52 }
 0xa4d   :  { %3220 = vrsqrt.f32 %v2470_v17  ;;  %v2471_v51 = vadd.f32 1e-05, %v2467_v46 }
 0xa4f   :  { %v3217_v20 = vpop.eup %3216  ;;  %3222 = vrsqrt.f32 %v2471_v51 }
 0xa50   :  { %v2476_v3 = vmul.f32 %v3217_v20, %v2448_v7 }
 0xa51   :  { %v3219_v11 = vpop.eup %3218 }
 0xa52   :  { %v2477_v28 = vmul.f32 %v3219_v11, %v2449_v23  ;;  %v2486_v33 = vmul.f32 %v2639_v57, %v2476_v3 }
 0xa54   :  { %v2487_v35 = vmul.f32 %v2639_v57, %v2477_v28  ;;  %v2496_v37 = vadd.f32 %v2640_v26, %v2486_v33 }
 0xa56   :  { %v2497_v38 = vadd.f32 %v2640_v26, %v2487_v35  ;;  %2500 = vst [vmem:[#allocation11] sm:$0xff] %v2496_v37 }
 0xa57   :  { %v3221_v40 = vpop.eup %3220 }
 0xa58   :  { %v2478_v42 = vmul.f32 %v3221_v40, %v2450_v41  ;;  %2501 = vst [vmem:[#allocation11 + $0x8] sm:$0xff] %v2497_v38 }
 0xa59   :  { %v3223_v39 = vpop.eup %3222 }
 0xa5a   :  { %v2479_v6 = vmul.f32 %v3223_v39, %v2451_v61  ;;  %v2488_v10 = vmul.f32 %v2639_v57, %v2478_v42 }
 0xa5c   :  { %v2489_v43 = vmul.f32 %v2639_v57, %v2479_v6  ;;  %v2498_v18 = vadd.f32 %v2640_v26, %v2488_v10 }
 0xa5e   :  { %v2499_v15 = vadd.f32 %v2640_v26, %v2489_v43  ;;  %2502 = vst [vmem:[#allocation11 + $0x10] sm:$0xff] %v2498_v18 }
 0xa60   :  { %2503 = vst [vmem:[#allocation11 + $0x18] sm:$0xff] %v2499_v15 }
 0xa61   :  { %3349 = shalt.err (!%p3346_p2)
}
 0xa62   :  { %s3350_s26 = scalar_lea.hbm %s3977_s12, 512 }
 0xa63   :  { %p3351_p3 = scmp.ne.s32.totalorder %s3977_s12, %s3350_s26  ;;  %p3354_p4 = scmp.lt.u32.totalorder %s3350_s26, %s3977_s12 }
 0xa65   :  { %p3356_p5 = pnand %p3354_p4, %p3351_p3 }
 0xa67   :  { %3359 = shalt.err (!%p3356_p5)
}
 0xa68   :  { %2515 = dma.vmem_to_hbm [thread:$0]  %s2510_s10, 512, %s3977_s12, [#allocation4], %s3375_s4, %s3375_s4, %s3376_s18  }
 0xa69   :  { %3366 = dma.done.wait [#allocation4], 512  }
 0xa6a   :  { %3367 = vsyncadd [#allocation4], 4294966784 }
 0xa6b   :  { %2519 = vsyncpa [#allocation3], 1 }
 0xa6c   :  { %2520 = vsyncpa [#allocation6], 1 }
 0xa6d   :  { %2521 = vsyncpa [#allocation9], 1 }
 0xa6e   :  { %2522 = vsyncpa [#allocation4], 1 }

</bundles_post_ra>
